<compile_context>
chip_gen: v5e
topology: v5e:2x2
jax: 0.10.0
libtpu: 0.0.40
codegen_flags: <defaults>
</compile_context>

<pallas_src>
import math

import jax
import jax.numpy as jnp
from jax.experimental import pallas as pl
from jax.experimental.pallas import tpu as pltpu

# Small synthetic model sizes consistent with the module.
D_MODEL = 32
D_FF = 64
N_HEADS = 4
D_K = 8
D_V = 8
LN_EPS = 1e-5

# Fixed ordering of the packed weight arrays passed to the fused kernel.
WEIGHT_ORDER = (
    'wqkv1', 'bqkv1', 'wo1', 'bo1', 'g1', 'be1',          # self-attention
    'wq2', 'bq2', 'wkv2', 'bkv2', 'wo2', 'bo2', 'g2', 'be2',  # cross-attention
    'w1', 'b1', 'w2', 'b2', 'g3', 'be3',                   # position-wise FFN
    'mavg',                                                # LayerNorm averaging matrix
)


# =====================================================================================
# Fused DecoderLayer kernel: grid = (batch,), everything for one batch element in VMEM.
# =====================================================================================
def decoder_layer_kernel(
        dec_ref, enc_ref, smask_ref, emask_ref,
        wqkv1_ref, bqkv1_ref, wo1_ref, bo1_ref, g1_ref, be1_ref,
        wq2_ref, bq2_ref, wkv2_ref, bkv2_ref, wo2_ref, bo2_ref, g2_ref, be2_ref,
        w1_ref, b1_ref, w2_ref, b2_ref, g3_ref, be3_ref, mavg_ref,
        out_ref, sattn_ref, eattn_ref):
    H, dk, dv = N_HEADS, D_K, D_V
    Hdk, Hdv = H * dk, H * dv

    x0 = dec_ref[...]                    # [S, D]  (also residual of self-attn)
    enc = enc_ref[...]                   # [Se, D]
    mavg = mavg_ref[...]                 # [D, D]  (each column = 1/D -> mean via MXU)

    def layer_norm(y, gamma, beta):
        mean = jnp.dot(y, mavg, preferred_element_type=jnp.float32)
        c = y - mean
        var = jnp.dot(c * c, mavg, preferred_element_type=jnp.float32)
        return c * jax.lax.rsqrt(var + LN_EPS) * gamma + beta

    def attention(q_all, k_all, v_all, mask):
        # q_all is already pre-scaled by 1/sqrt(d_k) (folded into W_Q/b_Q in the wrapper).
        attn_heads, ctx_heads = [], []
        for h in range(H):               # static, fully unrolled (H = 4)
            qh = q_all[:, h * dk:(h + 1) * dk]
            kh = k_all[:, h * dk:(h + 1) * dk]
            vh = v_all[:, h * dv:(h + 1) * dv]
            s = jax.lax.dot_general(qh, kh, (((1,), (1,)), ((), ())),
                                    preferred_element_type=jnp.float32)
            s = jnp.where(mask != 0, -1e9, s)        # masked_fill semantics
            m = jnp.max(s, axis=-1, keepdims=True)
            e = jnp.exp(s - m)
            a = e / jnp.sum(e, axis=-1, keepdims=True)   # exact divide (tolerance-safe)
            attn_heads.append(a)
            ctx_heads.append(jnp.dot(a, vh, preferred_element_type=jnp.float32))
        attn_all = jnp.concatenate(attn_heads, axis=-1)   # [Sq, H*Sk]  (packed, lane-wider)
        ctx_all = jnp.concatenate(ctx_heads, axis=-1)     # [Sq, H*dv]
        return attn_all, ctx_all

    # ---------------- Self attention (Q = K = V = dec_inputs) ----------------
    qkv = jnp.dot(x0, wqkv1_ref[...], preferred_element_type=jnp.float32) + bqkv1_ref[...]
    q1 = qkv[:, :Hdk]
    k1 = qkv[:, Hdk:2 * Hdk]
    v1 = qkv[:, 2 * Hdk:2 * Hdk + Hdv]
    attn1, ctx1 = attention(q1, k1, v1, smask_ref[...])
    sattn_ref[...] = attn1.astype(sattn_ref.dtype)
    y1 = jnp.dot(ctx1, wo1_ref[...], preferred_element_type=jnp.float32) + bo1_ref[...] + x0
    x1 = layer_norm(y1, g1_ref[...], be1_ref[...])

    # ---------------- Cross attention (Q = x1, K = V = enc_outputs) ----------------
    q2 = jnp.dot(x1, wq2_ref[...], preferred_element_type=jnp.float32) + bq2_ref[...]
    kv2 = jnp.dot(enc, wkv2_ref[...], preferred_element_type=jnp.float32) + bkv2_ref[...]
    k2 = kv2[:, :Hdk]
    v2 = kv2[:, Hdk:Hdk + Hdv]
    attn2, ctx2 = attention(q2, k2, v2, emask_ref[...])
    eattn_ref[...] = attn2.astype(eattn_ref.dtype)
    y2 = jnp.dot(ctx2, wo2_ref[...], preferred_element_type=jnp.float32) + bo2_ref[...] + x1
    x2 = layer_norm(y2, g2_ref[...], be2_ref[...])

    # ---------------- Position-wise FFN (Conv1d k=1 == per-position Linear) ----------------
    hid = jnp.maximum(
        jnp.dot(x2, w1_ref[...], preferred_element_type=jnp.float32) + b1_ref[...], 0.0)
    y3 = jnp.dot(hid, w2_ref[...], preferred_element_type=jnp.float32) + b2_ref[...] + x2
    out_ref[...] = layer_norm(y3, g3_ref[...], be3_ref[...]).astype(out_ref.dtype)


@jax.jit
def decoder_layer_forward(dec_inputs, enc_outputs, dec_self_attn_mask, dec_enc_attn_mask, kp):
    """dec_inputs:[B,S,D], enc_outputs:[B,Se,D], masks int32 (nonzero = masked)."""
    B, S, D = dec_inputs.shape
    Se = enc_outputs.shape[1]
    H = N_HEADS
    weights = [kp[k] for k in WEIGHT_ORDER]

    data_specs = [
        pl.BlockSpec((None, S, D), lambda b: (b, 0, 0)),     # dec_inputs
        pl.BlockSpec((None, Se, D), lambda b: (b, 0, 0)),    # enc_outputs
        pl.BlockSpec((None, S, S), lambda b: (b, 0, 0)),     # self-attn mask
        pl.BlockSpec((None, S, Se), lambda b: (b, 0, 0)),    # cross-attn mask
    ]
    # Weights: full block, constant index -> DMA'd once, VMEM-resident across grid steps.
    weight_specs = [pl.BlockSpec(w.shape, lambda b: (0, 0)) for w in weights]

    out, sattn_p, eattn_p = pl.pallas_call(
        decoder_layer_kernel,
        out_shape=(
            jax.ShapeDtypeStruct((B, S, D), dec_inputs.dtype),
            jax.ShapeDtypeStruct((B, S, H * S), jnp.float32),    # packed [b, q, h*Sk + k]
            jax.ShapeDtypeStruct((B, S, H * Se), jnp.float32),
        ),
        grid=(B,),
        in_specs=data_specs + weight_specs,
        out_specs=(
            pl.BlockSpec((None, S, D), lambda b: (b, 0, 0)),
            pl.BlockSpec((None, S, H * S), lambda b: (b, 0, 0)),
            pl.BlockSpec((None, S, H * Se), lambda b: (b, 0, 0)),
        ),
        compiler_params=pltpu.CompilerParams(dimension_semantics=("parallel",)),
    )(dec_inputs, enc_outputs, dec_self_attn_mask, dec_enc_attn_mask, *weights)

    # Unpack attention maps: [B, Sq, H*Sk] -> [B, H, Sq, Sk] (cheap wrapper-side reshape).
    self_attn = sattn_p.reshape(B, S, H, S).transpose(0, 2, 1, 3)
    enc_attn = eattn_p.reshape(B, S, H, Se).transpose(0, 2, 1, 3)
    return out, self_attn, enc_attn


# =====================================================================================
# Parameter packing (math layout -> fused kernel layout)
# =====================================================================================
def make_kernel_params(mp):
    """mp: dict with 'self_attn', 'enc_attn', 'ffn' in math layout (x @ W + b)."""
    sa, ea, ff = mp['self_attn'], mp['enc_attn'], mp['ffn']
    scale = 1.0 / math.sqrt(D_K)

    # Self-attn: fused QKV projection; fold the 1/sqrt(d_k) score scale into W_Q/b_Q.
    wqkv1 = jnp.concatenate([sa['wq'] * scale, sa['wk'], sa['wv']], axis=1)   # [D, 3*H*dk]
    bqkv1 = jnp.concatenate([sa['bq'] * scale, sa['bk'], sa['bv']]).reshape(1, -1)

    # Cross-attn: Q projection applies to x; K/V fused projection applies to enc_outputs.
    wq2 = ea['wq'] * scale
    bq2 = (ea['bq'] * scale).reshape(1, -1)
    wkv2 = jnp.concatenate([ea['wk'], ea['wv']], axis=1)                      # [D, 2*H*dk]
    bkv2 = jnp.concatenate([ea['bk'], ea['bv']]).reshape(1, -1)

    # LayerNorm mean via MXU: y @ mavg puts mean(y) in every lane.
    mavg = jnp.full((D_MODEL, D_MODEL), 1.0 / D_MODEL, jnp.float32)

    return dict(
        wqkv1=wqkv1, bqkv1=bqkv1,
        wo1=sa['wo'], bo1=sa['bo'].reshape(1, -1),
        g1=sa['gamma'].reshape(1, -1), be1=sa['beta'].reshape(1, -1),
        wq2=wq2, bq2=bq2, wkv2=wkv2, bkv2=bkv2,
        wo2=ea['wo'], bo2=ea['bo'].reshape(1, -1),
        g2=ea['gamma'].reshape(1, -1), be2=ea['beta'].reshape(1, -1),
        w1=ff['w1'], b1=ff['b1'].reshape(1, -1),
        w2=ff['w2'], b2=ff['b2'].reshape(1, -1),
        g3=ff['gamma'].reshape(1, -1), be3=ff['beta'].reshape(1, -1),
        mavg=mavg,
    )


# =====================================================================================
# Pure-JAX reference mirroring the PyTorch forward exactly (f32 everywhere).
# =====================================================================================
def ref_mha(Q, K, V, mask, m, H, dk, dv):
    B, Sq, D = Q.shape
    Sk = K.shape[1]
    q = (Q @ m['wq'] + m['bq']).reshape(B, Sq, H, dk).transpose(0, 2, 1, 3)
    k = (K @ m['wk'] + m['bk']).reshape(B, Sk, H, dk).transpose(0, 2, 1, 3)
    v = (V @ m['wv'] + m['bv']).reshape(B, Sk, H, dv).transpose(0, 2, 1, 3)
    scores = jnp.einsum('bhqd,bhkd->bhqk', q, k) / math.sqrt(dk)
    scores = jnp.where(mask[:, None, :, :] != 0, -1e9, scores)
    attn = jax.nn.softmax(scores, axis=-1)
    ctx = jnp.einsum('bhqk,bhkd->bhqd', attn, v)
    ctx = ctx.transpose(0, 2, 1, 3).reshape(B, Sq, H * dv)
    y = ctx @ m['wo'] + m['bo'] + Q
    mean = y.mean(-1, keepdims=True)
    var = ((y - mean) ** 2).mean(-1, keepdims=True)
    return (y - mean) * jax.lax.rsqrt(var + LN_EPS) * m['gamma'] + m['beta'], attn


def ref_ffn(x, f):
    h = jnp.maximum(x @ f['w1'] + f['b1'], 0.0)
    y = h @ f['w2'] + f['b2'] + x
    mean = y.mean(-1, keepdims=True)
    var = ((y - mean) ** 2).mean(-1, keepdims=True)
    return (y - mean) * jax.lax.rsqrt(var + LN_EPS) * f['gamma'] + f['beta']


def ref_decoder_layer(dec_inputs, enc_outputs, self_mask, enc_mask, rp):
    x, a1 = ref_mha(dec_inputs, dec_inputs, dec_inputs, self_mask,
                    rp['self_attn'], N_HEADS, D_K, D_V)
    x, a2 = ref_mha(x, enc_outputs, enc_outputs, enc_mask,
                    rp['enc_attn'], N_HEADS, D_K, D_V)
    x = ref_ffn(x, rp['ffn'])
    return x, a1, a2


# =====================================================================================
if __name__ == "__main__":
    key = jax.random.PRNGKey(0)
    B, S_DEC, S_ENC = 2, 8, 8

    keys = iter(jax.random.split(key, 32))

    def linear(kw, kb, fan_in, fan_out):
        w = jax.random.normal(kw, (fan_in, fan_out), jnp.float32) / math.sqrt(fan_in)
        b = jax.random.normal(kb, (fan_out,), jnp.float32) * 0.02
        return w, b

    def init_mha(ki):
        wq, bq = linear(next(ki), next(ki), D_MODEL, N_HEADS * D_K)
        wk, bk = linear(next(ki), next(ki), D_MODEL, N_HEADS * D_K)
        wv, bv = linear(next(ki), next(ki), D_MODEL, N_HEADS * D_V)
        wo, bo = linear(next(ki), next(ki), N_HEADS * D_V, D_MODEL)
        gamma = 1.0 + 0.1 * jax.random.normal(next(ki), (D_MODEL,), jnp.float32)
        beta = 0.02 * jax.random.normal(next(ki), (D_MODEL,), jnp.float32)
        return dict(wq=wq, bq=bq, wk=wk, bk=bk, wv=wv, bv=bv,
                    wo=wo, bo=bo, gamma=gamma, beta=beta)

    def init_ffn(ki):
        w1, b1 = linear(next(ki), next(ki), D_MODEL, D_FF)
        w2, b2 = linear(next(ki), next(ki), D_FF, D_MODEL)
        gamma = 1.0 + 0.1 * jax.random.normal(next(ki), (D_MODEL,), jnp.float32)
        beta = 0.02 * jax.random.normal(next(ki), (D_MODEL,), jnp.float32)
        return dict(w1=w1, b1=b1, w2=w2, b2=b2, gamma=gamma, beta=beta)

    math_params = dict(self_attn=init_mha(keys), enc_attn=init_mha(keys), ffn=init_ffn(keys))

    dec_inputs = jax.random.normal(next(keys), (B, S_DEC, D_MODEL), jnp.float32)
    enc_outputs = jax.random.normal(next(keys), (B, S_ENC, D_MODEL), jnp.float32)

    # Masks: nonzero = masked (matches masked_fill semantics). Self-attn: causal.
    causal = jnp.triu(jnp.ones((S_DEC, S_DEC), jnp.int32), k=1)
    dec_self_attn_mask = jnp.tile(causal[None], (B, 1, 1))
    # Cross-attn: last encoder position is padding.
    dec_enc_attn_mask = jnp.zeros((B, S_DEC, S_ENC), jnp.int32).at[:, :, -1].set(1)

    kernel_params = make_kernel_params(math_params)

    out, self_attn, enc_attn = decoder_layer_forward(
        dec_inputs, enc_outputs, dec_self_attn_mask, dec_enc_attn_mask, kernel_params)
    out, self_attn, enc_attn = jax.block_until_ready((out, self_attn, enc_attn))

    ref_out, ref_self_attn, ref_enc_attn = ref_decoder_layer(
        dec_inputs, enc_outputs, dec_self_attn_mask, dec_enc_attn_mask, math_params)

    assert out.shape == (B, S_DEC, D_MODEL)
    assert self_attn.shape == (B, N_HEADS, S_DEC, S_DEC)
    assert enc_attn.shape == (B, N_HEADS, S_DEC, S_ENC)
    # Activations are f32 end-to-end in the kernel; tolerances below only absorb TPU
    # default matmul-precision differences (XLA bf16-pass dots in the reference vs the
    # MXU f32 path inside the kernel), not any intentional low-precision compute.
    assert jnp.allclose(self_attn, ref_self_attn, atol=1e-2, rtol=1e-2)
    assert jnp.allclose(enc_attn, ref_enc_attn, atol=1e-2, rtol=1e-2)
    assert jnp.allclose(out, ref_out, atol=5e-2, rtol=5e-2)

    print("KERNEL_OK")
</pallas_src>

<mosaic_0001>
module attributes {stable_mosaic.version = 11 : i64} {
  func.func @decoder_layer_kernel(%arg0: i32, %arg1: memref<1x8x32xf32, #tpu.memory_space<vmem>>, %arg2: memref<1x8x32xf32, #tpu.memory_space<vmem>>, %arg3: memref<1x8x8xi32, #tpu.memory_space<vmem>>, %arg4: memref<1x8x8xi32, #tpu.memory_space<vmem>>, %arg5: memref<32x96xf32, #tpu.memory_space<vmem>>, %arg6: memref<1x96xf32, #tpu.memory_space<vmem>>, %arg7: memref<32x32xf32, #tpu.memory_space<vmem>>, %arg8: memref<1x32xf32, #tpu.memory_space<vmem>>, %arg9: memref<1x32xf32, #tpu.memory_space<vmem>>, %arg10: memref<1x32xf32, #tpu.memory_space<vmem>>, %arg11: memref<32x32xf32, #tpu.memory_space<vmem>>, %arg12: memref<1x32xf32, #tpu.memory_space<vmem>>, %arg13: memref<32x64xf32, #tpu.memory_space<vmem>>, %arg14: memref<1x64xf32, #tpu.memory_space<vmem>>, %arg15: memref<32x32xf32, #tpu.memory_space<vmem>>, %arg16: memref<1x32xf32, #tpu.memory_space<vmem>>, %arg17: memref<1x32xf32, #tpu.memory_space<vmem>>, %arg18: memref<1x32xf32, #tpu.memory_space<vmem>>, %arg19: memref<32x64xf32, #tpu.memory_space<vmem>>, %arg20: memref<1x64xf32, #tpu.memory_space<vmem>>, %arg21: memref<64x32xf32, #tpu.memory_space<vmem>>, %arg22: memref<1x32xf32, #tpu.memory_space<vmem>>, %arg23: memref<1x32xf32, #tpu.memory_space<vmem>>, %arg24: memref<1x32xf32, #tpu.memory_space<vmem>>, %arg25: memref<32x32xf32, #tpu.memory_space<vmem>>, %arg26: memref<1x8x32xf32, #tpu.memory_space<vmem>>, %arg27: memref<1x8x32xf32, #tpu.memory_space<vmem>>, %arg28: memref<1x8x32xf32, #tpu.memory_space<vmem>>) attributes {dimension_semantics = [#tpu.dimension_semantics<parallel>], iteration_bounds = array<i64: 2>, scalar_prefetch = 0 : i64, scratch_operands = 0 : i64, tpu.core_type = #tpu.core_type<tc>, window_params = [{transform_indices = @transform_0, window_bounds = array<i64: 1, 8, 32>}, {transform_indices = @transform_1, window_bounds = array<i64: 1, 8, 32>}, {transform_indices = @transform_2, window_bounds = array<i64: 1, 8, 8>}, {transform_indices = @transform_3, window_bounds = array<i64: 1, 8, 8>}, {pipeline_mode = #tpu.pipeline_mode<synchronous>, transform_indices = @transform_4, window_bounds = array<i64: 32, 96>}, {pipeline_mode = #tpu.pipeline_mode<synchronous>, transform_indices = @transform_5, window_bounds = array<i64: 1, 96>}, {pipeline_mode = #tpu.pipeline_mode<synchronous>, transform_indices = @transform_6, window_bounds = array<i64: 32, 32>}, {pipeline_mode = #tpu.pipeline_mode<synchronous>, transform_indices = @transform_7, window_bounds = array<i64: 1, 32>}, {pipeline_mode = #tpu.pipeline_mode<synchronous>, transform_indices = @transform_8, window_bounds = array<i64: 1, 32>}, {pipeline_mode = #tpu.pipeline_mode<synchronous>, transform_indices = @transform_9, window_bounds = array<i64: 1, 32>}, {pipeline_mode = #tpu.pipeline_mode<synchronous>, transform_indices = @transform_10, window_bounds = array<i64: 32, 32>}, {pipeline_mode = #tpu.pipeline_mode<synchronous>, transform_indices = @transform_11, window_bounds = array<i64: 1, 32>}, {pipeline_mode = #tpu.pipeline_mode<synchronous>, transform_indices = @transform_12, window_bounds = array<i64: 32, 64>}, {pipeline_mode = #tpu.pipeline_mode<synchronous>, transform_indices = @transform_13, window_bounds = array<i64: 1, 64>}, {pipeline_mode = #tpu.pipeline_mode<synchronous>, transform_indices = @transform_14, window_bounds = array<i64: 32, 32>}, {pipeline_mode = #tpu.pipeline_mode<synchronous>, transform_indices = @transform_15, window_bounds = array<i64: 1, 32>}, {pipeline_mode = #tpu.pipeline_mode<synchronous>, transform_indices = @transform_16, window_bounds = array<i64: 1, 32>}, {pipeline_mode = #tpu.pipeline_mode<synchronous>, transform_indices = @transform_17, window_bounds = array<i64: 1, 32>}, {pipeline_mode = #tpu.pipeline_mode<synchronous>, transform_indices = @transform_18, window_bounds = array<i64: 32, 64>}, {pipeline_mode = #tpu.pipeline_mode<synchronous>, transform_indices = @transform_19, window_bounds = array<i64: 1, 64>}, {pipeline_mode = #tpu.pipeline_mode<synchronous>, transform_indices = @transform_20, window_bounds = array<i64: 64, 32>}, {pipeline_mode = #tpu.pipeline_mode<synchronous>, transform_indices = @transform_21, window_bounds = array<i64: 1, 32>}, {pipeline_mode = #tpu.pipeline_mode<synchronous>, transform_indices = @transform_22, window_bounds = array<i64: 1, 32>}, {pipeline_mode = #tpu.pipeline_mode<synchronous>, transform_indices = @transform_23, window_bounds = array<i64: 1, 32>}, {pipeline_mode = #tpu.pipeline_mode<synchronous>, transform_indices = @transform_24, window_bounds = array<i64: 32, 32>}, {transform_indices = @transform_25, window_bounds = array<i64: 1, 8, 32>}, {transform_indices = @transform_26, window_bounds = array<i64: 1, 8, 32>}, {transform_indices = @transform_27, window_bounds = array<i64: 1, 8, 32>}]} {
    %c0 = arith.constant 0 : index
    %c0_0 = arith.constant 0 : index
    %c0_1 = arith.constant 0 : index
    %0 = vector.load %arg1[%c0, %c0_0, %c0_1] : memref<1x8x32xf32, #tpu.memory_space<vmem>>, vector<1x8x32xf32>
    %1 = vector.shape_cast %0 : vector<1x8x32xf32> to vector<8x32xf32>
    %c0_2 = arith.constant 0 : index
    %c0_3 = arith.constant 0 : index
    %c0_4 = arith.constant 0 : index
    %2 = vector.load %arg2[%c0_2, %c0_3, %c0_4] : memref<1x8x32xf32, #tpu.memory_space<vmem>>, vector<1x8x32xf32>
    %3 = vector.shape_cast %2 : vector<1x8x32xf32> to vector<8x32xf32>
    %c0_5 = arith.constant 0 : index
    %c0_6 = arith.constant 0 : index
    %4 = vector.load %arg25[%c0_5, %c0_6] : memref<32x32xf32, #tpu.memory_space<vmem>>, vector<32x32xf32>
    %c0_7 = arith.constant 0 : index
    %c0_8 = arith.constant 0 : index
    %5 = vector.load %arg5[%c0_7, %c0_8] : memref<32x96xf32, #tpu.memory_space<vmem>>, vector<32x96xf32>
    %cst = arith.constant dense<0.000000e+00> : vector<8x96xf32>
    %6 = tpu.matmul %1, %5, %cst {dimension_numbers = #tpu.dot_dimension_numbers<[1], [0], [0], [1], [0, 0, 1, 1], [], []>} : vector<8x32xf32>, vector<32x96xf32>, vector<8x96xf32> -> vector<8x96xf32>
    %c0_9 = arith.constant 0 : index
    %c0_10 = arith.constant 0 : index
    %7 = vector.load %arg6[%c0_9, %c0_10] : memref<1x96xf32, #tpu.memory_space<vmem>>, vector<1x96xf32>
    %8 = vector.broadcast %7 : vector<1x96xf32> to vector<8x96xf32>
    %9 = arith.addf %6, %8 : vector<8x96xf32>
    %10 = vector.extract_strided_slice %9 {offsets = [0, 0], sizes = [8, 32], strides = [1, 1]} : vector<8x96xf32> to vector<8x32xf32>
    %11 = vector.extract_strided_slice %9 {offsets = [0, 32], sizes = [8, 32], strides = [1, 1]} : vector<8x96xf32> to vector<8x32xf32>
    %12 = vector.extract_strided_slice %9 {offsets = [0, 64], sizes = [8, 32], strides = [1, 1]} : vector<8x96xf32> to vector<8x32xf32>
    %c0_11 = arith.constant 0 : index
    %c0_12 = arith.constant 0 : index
    %c0_13 = arith.constant 0 : index
    %13 = vector.load %arg3[%c0_11, %c0_12, %c0_13] : memref<1x8x8xi32, #tpu.memory_space<vmem>>, vector<1x8x8xi32>
    %14 = vector.shape_cast %13 : vector<1x8x8xi32> to vector<8x8xi32>
    %15 = vector.extract_strided_slice %10 {offsets = [0, 0], sizes = [8, 8], strides = [1, 1]} : vector<8x32xf32> to vector<8x8xf32>
    %16 = vector.extract_strided_slice %11 {offsets = [0, 0], sizes = [8, 8], strides = [1, 1]} : vector<8x32xf32> to vector<8x8xf32>
    %17 = vector.extract_strided_slice %12 {offsets = [0, 0], sizes = [8, 8], strides = [1, 1]} : vector<8x32xf32> to vector<8x8xf32>
    %cst_14 = arith.constant dense<0.000000e+00> : vector<8x8xf32>
    %18 = tpu.matmul %15, %16, %cst_14 {dimension_numbers = #tpu.dot_dimension_numbers<[1], [1], [0], [0], [0, 0, 1, 0], [], []>} : vector<8x8xf32>, vector<8x8xf32>, vector<8x8xf32> -> vector<8x8xf32>
    %c0_i32 = arith.constant 0 : i32
    %19 = vector.broadcast %c0_i32 : i32 to vector<8x8xi32>
    %20 = arith.cmpi ne, %14, %19 : vector<8x8xi32>
    %cst_15 = arith.constant -1.000000e+09 : f32
    %21 = vector.broadcast %cst_15 : f32 to vector<8x8xf32>
    %22 = arith.select %20, %21, %18 : vector<8x8xi1>, vector<8x8xf32>
    %cst_16 = arith.constant dense<0xFF800000> : vector<8xf32>
    %23 = vector.multi_reduction <maximumf>, %22, %cst_16 [1] : vector<8x8xf32> to vector<8xf32>
    %24 = vector.shape_cast %23 : vector<8xf32> to vector<8x1xf32>
    %25 = vector.broadcast %24 : vector<8x1xf32> to vector<8x8xf32>
    %26 = arith.subf %22, %25 : vector<8x8xf32>
    %27 = math.exp %26 : vector<8x8xf32>
    %cst_17 = arith.constant dense<0.000000e+00> : vector<8xf32>
    %28 = vector.multi_reduction <add>, %27, %cst_17 [1] : vector<8x8xf32> to vector<8xf32>
    %29 = vector.shape_cast %28 : vector<8xf32> to vector<8x1xf32>
    %30 = vector.broadcast %29 : vector<8x1xf32> to vector<8x8xf32>
    %31 = arith.divf %27, %30 : vector<8x8xf32>
    %cst_18 = arith.constant dense<0.000000e+00> : vector<8x8xf32>
    %32 = tpu.matmul %31, %17, %cst_18 {dimension_numbers = #tpu.dot_dimension_numbers<[1], [0], [0], [1], [0, 0, 1, 1], [], []>} : vector<8x8xf32>, vector<8x8xf32>, vector<8x8xf32> -> vector<8x8xf32>
    %33 = vector.extract_strided_slice %10 {offsets = [0, 8], sizes = [8, 8], strides = [1, 1]} : vector<8x32xf32> to vector<8x8xf32>
    %34 = vector.extract_strided_slice %11 {offsets = [0, 8], sizes = [8, 8], strides = [1, 1]} : vector<8x32xf32> to vector<8x8xf32>
    %35 = vector.extract_strided_slice %12 {offsets = [0, 8], sizes = [8, 8], strides = [1, 1]} : vector<8x32xf32> to vector<8x8xf32>
    %cst_19 = arith.constant dense<0.000000e+00> : vector<8x8xf32>
    %36 = tpu.matmul %33, %34, %cst_19 {dimension_numbers = #tpu.dot_dimension_numbers<[1], [1], [0], [0], [0, 0, 1, 0], [], []>} : vector<8x8xf32>, vector<8x8xf32>, vector<8x8xf32> -> vector<8x8xf32>
    %c0_i32_20 = arith.constant 0 : i32
    %37 = vector.broadcast %c0_i32_20 : i32 to vector<8x8xi32>
    %38 = arith.cmpi ne, %14, %37 : vector<8x8xi32>
    %cst_21 = arith.constant -1.000000e+09 : f32
    %39 = vector.broadcast %cst_21 : f32 to vector<8x8xf32>
    %40 = arith.select %38, %39, %36 : vector<8x8xi1>, vector<8x8xf32>
    %cst_22 = arith.constant dense<0xFF800000> : vector<8xf32>
    %41 = vector.multi_reduction <maximumf>, %40, %cst_22 [1] : vector<8x8xf32> to vector<8xf32>
    %42 = vector.shape_cast %41 : vector<8xf32> to vector<8x1xf32>
    %43 = vector.broadcast %42 : vector<8x1xf32> to vector<8x8xf32>
    %44 = arith.subf %40, %43 : vector<8x8xf32>
    %45 = math.exp %44 : vector<8x8xf32>
    %cst_23 = arith.constant dense<0.000000e+00> : vector<8xf32>
    %46 = vector.multi_reduction <add>, %45, %cst_23 [1] : vector<8x8xf32> to vector<8xf32>
    %47 = vector.shape_cast %46 : vector<8xf32> to vector<8x1xf32>
    %48 = vector.broadcast %47 : vector<8x1xf32> to vector<8x8xf32>
    %49 = arith.divf %45, %48 : vector<8x8xf32>
    %cst_24 = arith.constant dense<0.000000e+00> : vector<8x8xf32>
    %50 = tpu.matmul %49, %35, %cst_24 {dimension_numbers = #tpu.dot_dimension_numbers<[1], [0], [0], [1], [0, 0, 1, 1], [], []>} : vector<8x8xf32>, vector<8x8xf32>, vector<8x8xf32> -> vector<8x8xf32>
    %51 = vector.extract_strided_slice %10 {offsets = [0, 16], sizes = [8, 8], strides = [1, 1]} : vector<8x32xf32> to vector<8x8xf32>
    %52 = vector.extract_strided_slice %11 {offsets = [0, 16], sizes = [8, 8], strides = [1, 1]} : vector<8x32xf32> to vector<8x8xf32>
    %53 = vector.extract_strided_slice %12 {offsets = [0, 16], sizes = [8, 8], strides = [1, 1]} : vector<8x32xf32> to vector<8x8xf32>
    %cst_25 = arith.constant dense<0.000000e+00> : vector<8x8xf32>
    %54 = tpu.matmul %51, %52, %cst_25 {dimension_numbers = #tpu.dot_dimension_numbers<[1], [1], [0], [0], [0, 0, 1, 0], [], []>} : vector<8x8xf32>, vector<8x8xf32>, vector<8x8xf32> -> vector<8x8xf32>
    %c0_i32_26 = arith.constant 0 : i32
    %55 = vector.broadcast %c0_i32_26 : i32 to vector<8x8xi32>
    %56 = arith.cmpi ne, %14, %55 : vector<8x8xi32>
    %cst_27 = arith.constant -1.000000e+09 : f32
    %57 = vector.broadcast %cst_27 : f32 to vector<8x8xf32>
    %58 = arith.select %56, %57, %54 : vector<8x8xi1>, vector<8x8xf32>
    %cst_28 = arith.constant dense<0xFF800000> : vector<8xf32>
    %59 = vector.multi_reduction <maximumf>, %58, %cst_28 [1] : vector<8x8xf32> to vector<8xf32>
    %60 = vector.shape_cast %59 : vector<8xf32> to vector<8x1xf32>
    %61 = vector.broadcast %60 : vector<8x1xf32> to vector<8x8xf32>
    %62 = arith.subf %58, %61 : vector<8x8xf32>
    %63 = math.exp %62 : vector<8x8xf32>
    %cst_29 = arith.constant dense<0.000000e+00> : vector<8xf32>
    %64 = vector.multi_reduction <add>, %63, %cst_29 [1] : vector<8x8xf32> to vector<8xf32>
    %65 = vector.shape_cast %64 : vector<8xf32> to vector<8x1xf32>
    %66 = vector.broadcast %65 : vector<8x1xf32> to vector<8x8xf32>
    %67 = arith.divf %63, %66 : vector<8x8xf32>
    %cst_30 = arith.constant dense<0.000000e+00> : vector<8x8xf32>
    %68 = tpu.matmul %67, %53, %cst_30 {dimension_numbers = #tpu.dot_dimension_numbers<[1], [0], [0], [1], [0, 0, 1, 1], [], []>} : vector<8x8xf32>, vector<8x8xf32>, vector<8x8xf32> -> vector<8x8xf32>
    %69 = vector.extract_strided_slice %10 {offsets = [0, 24], sizes = [8, 8], strides = [1, 1]} : vector<8x32xf32> to vector<8x8xf32>
    %70 = vector.extract_strided_slice %11 {offsets = [0, 24], sizes = [8, 8], strides = [1, 1]} : vector<8x32xf32> to vector<8x8xf32>
    %71 = vector.extract_strided_slice %12 {offsets = [0, 24], sizes = [8, 8], strides = [1, 1]} : vector<8x32xf32> to vector<8x8xf32>
    %cst_31 = arith.constant dense<0.000000e+00> : vector<8x8xf32>
    %72 = tpu.matmul %69, %70, %cst_31 {dimension_numbers = #tpu.dot_dimension_numbers<[1], [1], [0], [0], [0, 0, 1, 0], [], []>} : vector<8x8xf32>, vector<8x8xf32>, vector<8x8xf32> -> vector<8x8xf32>
    %c0_i32_32 = arith.constant 0 : i32
    %73 = vector.broadcast %c0_i32_32 : i32 to vector<8x8xi32>
    %74 = arith.cmpi ne, %14, %73 : vector<8x8xi32>
    %cst_33 = arith.constant -1.000000e+09 : f32
    %75 = vector.broadcast %cst_33 : f32 to vector<8x8xf32>
    %76 = arith.select %74, %75, %72 : vector<8x8xi1>, vector<8x8xf32>
    %cst_34 = arith.constant dense<0xFF800000> : vector<8xf32>
    %77 = vector.multi_reduction <maximumf>, %76, %cst_34 [1] : vector<8x8xf32> to vector<8xf32>
    %78 = vector.shape_cast %77 : vector<8xf32> to vector<8x1xf32>
    %79 = vector.broadcast %78 : vector<8x1xf32> to vector<8x8xf32>
    %80 = arith.subf %76, %79 : vector<8x8xf32>
    %81 = math.exp %80 : vector<8x8xf32>
    %cst_35 = arith.constant dense<0.000000e+00> : vector<8xf32>
    %82 = vector.multi_reduction <add>, %81, %cst_35 [1] : vector<8x8xf32> to vector<8xf32>
    %83 = vector.shape_cast %82 : vector<8xf32> to vector<8x1xf32>
    %84 = vector.broadcast %83 : vector<8x1xf32> to vector<8x8xf32>
    %85 = arith.divf %81, %84 : vector<8x8xf32>
    %cst_36 = arith.constant dense<0.000000e+00> : vector<8x8xf32>
    %86 = tpu.matmul %85, %71, %cst_36 {dimension_numbers = #tpu.dot_dimension_numbers<[1], [0], [0], [1], [0, 0, 1, 1], [], []>} : vector<8x8xf32>, vector<8x8xf32>, vector<8x8xf32> -> vector<8x8xf32>
    %87 = tpu.concatenate %31, %49, %67, %85 in 1 : vector<8x8xf32>, vector<8x8xf32>, vector<8x8xf32>, vector<8x8xf32> -> vector<8x32xf32>
    %88 = tpu.concatenate %32, %50, %68, %86 in 1 : vector<8x8xf32>, vector<8x8xf32>, vector<8x8xf32>, vector<8x8xf32> -> vector<8x32xf32>
    %c0_37 = arith.constant 0 : index
    %c0_38 = arith.constant 0 : index
    %c0_39 = arith.constant 0 : index
    %89 = vector.load %arg27[%c0_37, %c0_38, %c0_39] : memref<1x8x32xf32, #tpu.memory_space<vmem>>, vector<1x8x32xf32>
    %90 = vector.shape_cast %89 : vector<1x8x32xf32> to vector<8x32xf32>
    %91 = vector.shape_cast %87 : vector<8x32xf32> to vector<1x8x32xf32>
    tpu.vector_store %arg27[%c0_37, %c0_38, %c0_39], %91 {strides = array<i32>} : memref<1x8x32xf32, #tpu.memory_space<vmem>>, vector<1x8x32xf32>,
    %c0_40 = arith.constant 0 : index
    %c0_41 = arith.constant 0 : index
    %92 = vector.load %arg7[%c0_40, %c0_41] : memref<32x32xf32, #tpu.memory_space<vmem>>, vector<32x32xf32>
    %cst_42 = arith.constant dense<0.000000e+00> : vector<8x32xf32>
    %93 = tpu.matmul %88, %92, %cst_42 {dimension_numbers = #tpu.dot_dimension_numbers<[1], [0], [0], [1], [0, 0, 1, 1], [], []>} : vector<8x32xf32>, vector<32x32xf32>, vector<8x32xf32> -> vector<8x32xf32>
    %c0_43 = arith.constant 0 : index
    %c0_44 = arith.constant 0 : index
    %94 = vector.load %arg8[%c0_43, %c0_44] : memref<1x32xf32, #tpu.memory_space<vmem>>, vector<1x32xf32>
    %95 = vector.broadcast %94 : vector<1x32xf32> to vector<8x32xf32>
    %96 = arith.addf %93, %95 : vector<8x32xf32>
    %97 = arith.addf %96, %1 : vector<8x32xf32>
    %c0_45 = arith.constant 0 : index
    %c0_46 = arith.constant 0 : index
    %98 = vector.load %arg9[%c0_45, %c0_46] : memref<1x32xf32, #tpu.memory_space<vmem>>, vector<1x32xf32>
    %c0_47 = arith.constant 0 : index
    %c0_48 = arith.constant 0 : index
    %99 = vector.load %arg10[%c0_47, %c0_48] : memref<1x32xf32, #tpu.memory_space<vmem>>, vector<1x32xf32>
    %cst_49 = arith.constant dense<0.000000e+00> : vector<8x32xf32>
    %100 = tpu.matmul %97, %4, %cst_49 {dimension_numbers = #tpu.dot_dimension_numbers<[1], [0], [0], [1], [0, 0, 1, 1], [], []>} : vector<8x32xf32>, vector<32x32xf32>, vector<8x32xf32> -> vector<8x32xf32>
    %101 = arith.subf %97, %100 : vector<8x32xf32>
    %102 = arith.mulf %101, %101 : vector<8x32xf32>
    %cst_50 = arith.constant dense<0.000000e+00> : vector<8x32xf32>
    %103 = tpu.matmul %102, %4, %cst_50 {dimension_numbers = #tpu.dot_dimension_numbers<[1], [0], [0], [1], [0, 0, 1, 1], [], []>} : vector<8x32xf32>, vector<32x32xf32>, vector<8x32xf32> -> vector<8x32xf32>
    %cst_51 = arith.constant 9.99999974E-6 : f32
    %104 = vector.broadcast %cst_51 : f32 to vector<8x32xf32>
    %105 = arith.addf %103, %104 : vector<8x32xf32>
    %106 = math.rsqrt %105 : vector<8x32xf32>
    %107 = arith.mulf %101, %106 : vector<8x32xf32>
    %108 = vector.broadcast %98 : vector<1x32xf32> to vector<8x32xf32>
    %109 = arith.mulf %107, %108 : vector<8x32xf32>
    %110 = vector.broadcast %99 : vector<1x32xf32> to vector<8x32xf32>
    %111 = arith.addf %109, %110 : vector<8x32xf32>
    %c0_52 = arith.constant 0 : index
    %c0_53 = arith.constant 0 : index
    %112 = vector.load %arg11[%c0_52, %c0_53] : memref<32x32xf32, #tpu.memory_space<vmem>>, vector<32x32xf32>
    %cst_54 = arith.constant dense<0.000000e+00> : vector<8x32xf32>
    %113 = tpu.matmul %111, %112, %cst_54 {dimension_numbers = #tpu.dot_dimension_numbers<[1], [0], [0], [1], [0, 0, 1, 1], [], []>} : vector<8x32xf32>, vector<32x32xf32>, vector<8x32xf32> -> vector<8x32xf32>
    %c0_55 = arith.constant 0 : index
    %c0_56 = arith.constant 0 : index
    %114 = vector.load %arg12[%c0_55, %c0_56] : memref<1x32xf32, #tpu.memory_space<vmem>>, vector<1x32xf32>
    %115 = vector.broadcast %114 : vector<1x32xf32> to vector<8x32xf32>
    %116 = arith.addf %113, %115 : vector<8x32xf32>
    %c0_57 = arith.constant 0 : index
    %c0_58 = arith.constant 0 : index
    %117 = vector.load %arg13[%c0_57, %c0_58] : memref<32x64xf32, #tpu.memory_space<vmem>>, vector<32x64xf32>
    %cst_59 = arith.constant dense<0.000000e+00> : vector<8x64xf32>
    %118 = tpu.matmul %3, %117, %cst_59 {dimension_numbers = #tpu.dot_dimension_numbers<[1], [0], [0], [1], [0, 0, 1, 1], [], []>} : vector<8x32xf32>, vector<32x64xf32>, vector<8x64xf32> -> vector<8x64xf32>
    %c0_60 = arith.constant 0 : index
    %c0_61 = arith.constant 0 : index
    %119 = vector.load %arg14[%c0_60, %c0_61] : memref<1x64xf32, #tpu.memory_space<vmem>>, vector<1x64xf32>
    %120 = vector.broadcast %119 : vector<1x64xf32> to vector<8x64xf32>
    %121 = arith.addf %118, %120 : vector<8x64xf32>
    %122 = vector.extract_strided_slice %121 {offsets = [0, 0], sizes = [8, 32], strides = [1, 1]} : vector<8x64xf32> to vector<8x32xf32>
    %123 = vector.extract_strided_slice %121 {offsets = [0, 32], sizes = [8, 32], strides = [1, 1]} : vector<8x64xf32> to vector<8x32xf32>
    %c0_62 = arith.constant 0 : index
    %c0_63 = arith.constant 0 : index
    %c0_64 = arith.constant 0 : index
    %124 = vector.load %arg4[%c0_62, %c0_63, %c0_64] : memref<1x8x8xi32, #tpu.memory_space<vmem>>, vector<1x8x8xi32>
    %125 = vector.shape_cast %124 : vector<1x8x8xi32> to vector<8x8xi32>
    %126 = vector.extract_strided_slice %116 {offsets = [0, 0], sizes = [8, 8], strides = [1, 1]} : vector<8x32xf32> to vector<8x8xf32>
    %127 = vector.extract_strided_slice %122 {offsets = [0, 0], sizes = [8, 8], strides = [1, 1]} : vector<8x32xf32> to vector<8x8xf32>
    %128 = vector.extract_strided_slice %123 {offsets = [0, 0], sizes = [8, 8], strides = [1, 1]} : vector<8x32xf32> to vector<8x8xf32>
    %cst_65 = arith.constant dense<0.000000e+00> : vector<8x8xf32>
    %129 = tpu.matmul %126, %127, %cst_65 {dimension_numbers = #tpu.dot_dimension_numbers<[1], [1], [0], [0], [0, 0, 1, 0], [], []>} : vector<8x8xf32>, vector<8x8xf32>, vector<8x8xf32> -> vector<8x8xf32>
    %c0_i32_66 = arith.constant 0 : i32
    %130 = vector.broadcast %c0_i32_66 : i32 to vector<8x8xi32>
    %131 = arith.cmpi ne, %125, %130 : vector<8x8xi32>
    %cst_67 = arith.constant -1.000000e+09 : f32
    %132 = vector.broadcast %cst_67 : f32 to vector<8x8xf32>
    %133 = arith.select %131, %132, %129 : vector<8x8xi1>, vector<8x8xf32>
    %cst_68 = arith.constant dense<0xFF800000> : vector<8xf32>
    %134 = vector.multi_reduction <maximumf>, %133, %cst_68 [1] : vector<8x8xf32> to vector<8xf32>
    %135 = vector.shape_cast %134 : vector<8xf32> to vector<8x1xf32>
    %136 = vector.broadcast %135 : vector<8x1xf32> to vector<8x8xf32>
    %137 = arith.subf %133, %136 : vector<8x8xf32>
    %138 = math.exp %137 : vector<8x8xf32>
    %cst_69 = arith.constant dense<0.000000e+00> : vector<8xf32>
    %139 = vector.multi_reduction <add>, %138, %cst_69 [1] : vector<8x8xf32> to vector<8xf32>
    %140 = vector.shape_cast %139 : vector<8xf32> to vector<8x1xf32>
    %141 = vector.broadcast %140 : vector<8x1xf32> to vector<8x8xf32>
    %142 = arith.divf %138, %141 : vector<8x8xf32>
    %cst_70 = arith.constant dense<0.000000e+00> : vector<8x8xf32>
    %143 = tpu.matmul %142, %128, %cst_70 {dimension_numbers = #tpu.dot_dimension_numbers<[1], [0], [0], [1], [0, 0, 1, 1], [], []>} : vector<8x8xf32>, vector<8x8xf32>, vector<8x8xf32> -> vector<8x8xf32>
    %144 = vector.extract_strided_slice %116 {offsets = [0, 8], sizes = [8, 8], strides = [1, 1]} : vector<8x32xf32> to vector<8x8xf32>
    %145 = vector.extract_strided_slice %122 {offsets = [0, 8], sizes = [8, 8], strides = [1, 1]} : vector<8x32xf32> to vector<8x8xf32>
    %146 = vector.extract_strided_slice %123 {offsets = [0, 8], sizes = [8, 8], strides = [1, 1]} : vector<8x32xf32> to vector<8x8xf32>
    %cst_71 = arith.constant dense<0.000000e+00> : vector<8x8xf32>
    %147 = tpu.matmul %144, %145, %cst_71 {dimension_numbers = #tpu.dot_dimension_numbers<[1], [1], [0], [0], [0, 0, 1, 0], [], []>} : vector<8x8xf32>, vector<8x8xf32>, vector<8x8xf32> -> vector<8x8xf32>
    %c0_i32_72 = arith.constant 0 : i32
    %148 = vector.broadcast %c0_i32_72 : i32 to vector<8x8xi32>
    %149 = arith.cmpi ne, %125, %148 : vector<8x8xi32>
    %cst_73 = arith.constant -1.000000e+09 : f32
    %150 = vector.broadcast %cst_73 : f32 to vector<8x8xf32>
    %151 = arith.select %149, %150, %147 : vector<8x8xi1>, vector<8x8xf32>
    %cst_74 = arith.constant dense<0xFF800000> : vector<8xf32>
    %152 = vector.multi_reduction <maximumf>, %151, %cst_74 [1] : vector<8x8xf32> to vector<8xf32>
    %153 = vector.shape_cast %152 : vector<8xf32> to vector<8x1xf32>
    %154 = vector.broadcast %153 : vector<8x1xf32> to vector<8x8xf32>
    %155 = arith.subf %151, %154 : vector<8x8xf32>
    %156 = math.exp %155 : vector<8x8xf32>
    %cst_75 = arith.constant dense<0.000000e+00> : vector<8xf32>
    %157 = vector.multi_reduction <add>, %156, %cst_75 [1] : vector<8x8xf32> to vector<8xf32>
    %158 = vector.shape_cast %157 : vector<8xf32> to vector<8x1xf32>
    %159 = vector.broadcast %158 : vector<8x1xf32> to vector<8x8xf32>
    %160 = arith.divf %156, %159 : vector<8x8xf32>
    %cst_76 = arith.constant dense<0.000000e+00> : vector<8x8xf32>
    %161 = tpu.matmul %160, %146, %cst_76 {dimension_numbers = #tpu.dot_dimension_numbers<[1], [0], [0], [1], [0, 0, 1, 1], [], []>} : vector<8x8xf32>, vector<8x8xf32>, vector<8x8xf32> -> vector<8x8xf32>
    %162 = vector.extract_strided_slice %116 {offsets = [0, 16], sizes = [8, 8], strides = [1, 1]} : vector<8x32xf32> to vector<8x8xf32>
    %163 = vector.extract_strided_slice %122 {offsets = [0, 16], sizes = [8, 8], strides = [1, 1]} : vector<8x32xf32> to vector<8x8xf32>
    %164 = vector.extract_strided_slice %123 {offsets = [0, 16], sizes = [8, 8], strides = [1, 1]} : vector<8x32xf32> to vector<8x8xf32>
    %cst_77 = arith.constant dense<0.000000e+00> : vector<8x8xf32>
    %165 = tpu.matmul %162, %163, %cst_77 {dimension_numbers = #tpu.dot_dimension_numbers<[1], [1], [0], [0], [0, 0, 1, 0], [], []>} : vector<8x8xf32>, vector<8x8xf32>, vector<8x8xf32> -> vector<8x8xf32>
    %c0_i32_78 = arith.constant 0 : i32
    %166 = vector.broadcast %c0_i32_78 : i32 to vector<8x8xi32>
    %167 = arith.cmpi ne, %125, %166 : vector<8x8xi32>
    %cst_79 = arith.constant -1.000000e+09 : f32
    %168 = vector.broadcast %cst_79 : f32 to vector<8x8xf32>
    %169 = arith.select %167, %168, %165 : vector<8x8xi1>, vector<8x8xf32>
    %cst_80 = arith.constant dense<0xFF800000> : vector<8xf32>
    %170 = vector.multi_reduction <maximumf>, %169, %cst_80 [1] : vector<8x8xf32> to vector<8xf32>
    %171 = vector.shape_cast %170 : vector<8xf32> to vector<8x1xf32>
    %172 = vector.broadcast %171 : vector<8x1xf32> to vector<8x8xf32>
    %173 = arith.subf %169, %172 : vector<8x8xf32>
    %174 = math.exp %173 : vector<8x8xf32>
    %cst_81 = arith.constant dense<0.000000e+00> : vector<8xf32>
    %175 = vector.multi_reduction <add>, %174, %cst_81 [1] : vector<8x8xf32> to vector<8xf32>
    %176 = vector.shape_cast %175 : vector<8xf32> to vector<8x1xf32>
    %177 = vector.broadcast %176 : vector<8x1xf32> to vector<8x8xf32>
    %178 = arith.divf %174, %177 : vector<8x8xf32>
    %cst_82 = arith.constant dense<0.000000e+00> : vector<8x8xf32>
    %179 = tpu.matmul %178, %164, %cst_82 {dimension_numbers = #tpu.dot_dimension_numbers<[1], [0], [0], [1], [0, 0, 1, 1], [], []>} : vector<8x8xf32>, vector<8x8xf32>, vector<8x8xf32> -> vector<8x8xf32>
    %180 = vector.extract_strided_slice %116 {offsets = [0, 24], sizes = [8, 8], strides = [1, 1]} : vector<8x32xf32> to vector<8x8xf32>
    %181 = vector.extract_strided_slice %122 {offsets = [0, 24], sizes = [8, 8], strides = [1, 1]} : vector<8x32xf32> to vector<8x8xf32>
    %182 = vector.extract_strided_slice %123 {offsets = [0, 24], sizes = [8, 8], strides = [1, 1]} : vector<8x32xf32> to vector<8x8xf32>
    %cst_83 = arith.constant dense<0.000000e+00> : vector<8x8xf32>
    %183 = tpu.matmul %180, %181, %cst_83 {dimension_numbers = #tpu.dot_dimension_numbers<[1], [1], [0], [0], [0, 0, 1, 0], [], []>} : vector<8x8xf32>, vector<8x8xf32>, vector<8x8xf32> -> vector<8x8xf32>
    %c0_i32_84 = arith.constant 0 : i32
    %184 = vector.broadcast %c0_i32_84 : i32 to vector<8x8xi32>
    %185 = arith.cmpi ne, %125, %184 : vector<8x8xi32>
    %cst_85 = arith.constant -1.000000e+09 : f32
    %186 = vector.broadcast %cst_85 : f32 to vector<8x8xf32>
    %187 = arith.select %185, %186, %183 : vector<8x8xi1>, vector<8x8xf32>
    %cst_86 = arith.constant dense<0xFF800000> : vector<8xf32>
    %188 = vector.multi_reduction <maximumf>, %187, %cst_86 [1] : vector<8x8xf32> to vector<8xf32>
    %189 = vector.shape_cast %188 : vector<8xf32> to vector<8x1xf32>
    %190 = vector.broadcast %189 : vector<8x1xf32> to vector<8x8xf32>
    %191 = arith.subf %187, %190 : vector<8x8xf32>
    %192 = math.exp %191 : vector<8x8xf32>
    %cst_87 = arith.constant dense<0.000000e+00> : vector<8xf32>
    %193 = vector.multi_reduction <add>, %192, %cst_87 [1] : vector<8x8xf32> to vector<8xf32>
    %194 = vector.shape_cast %193 : vector<8xf32> to vector<8x1xf32>
    %195 = vector.broadcast %194 : vector<8x1xf32> to vector<8x8xf32>
    %196 = arith.divf %192, %195 : vector<8x8xf32>
    %cst_88 = arith.constant dense<0.000000e+00> : vector<8x8xf32>
    %197 = tpu.matmul %196, %182, %cst_88 {dimension_numbers = #tpu.dot_dimension_numbers<[1], [0], [0], [1], [0, 0, 1, 1], [], []>} : vector<8x8xf32>, vector<8x8xf32>, vector<8x8xf32> -> vector<8x8xf32>
    %198 = tpu.concatenate %142, %160, %178, %196 in 1 : vector<8x8xf32>, vector<8x8xf32>, vector<8x8xf32>, vector<8x8xf32> -> vector<8x32xf32>
    %199 = tpu.concatenate %143, %161, %179, %197 in 1 : vector<8x8xf32>, vector<8x8xf32>, vector<8x8xf32>, vector<8x8xf32> -> vector<8x32xf32>
    %c0_89 = arith.constant 0 : index
    %c0_90 = arith.constant 0 : index
    %c0_91 = arith.constant 0 : index
    %200 = vector.load %arg28[%c0_89, %c0_90, %c0_91] : memref<1x8x32xf32, #tpu.memory_space<vmem>>, vector<1x8x32xf32>
    %201 = vector.shape_cast %200 : vector<1x8x32xf32> to vector<8x32xf32>
    %202 = vector.shape_cast %198 : vector<8x32xf32> to vector<1x8x32xf32>
    tpu.vector_store %arg28[%c0_89, %c0_90, %c0_91], %202 {strides = array<i32>} : memref<1x8x32xf32, #tpu.memory_space<vmem>>, vector<1x8x32xf32>,
    %c0_92 = arith.constant 0 : index
    %c0_93 = arith.constant 0 : index
    %203 = vector.load %arg15[%c0_92, %c0_93] : memref<32x32xf32, #tpu.memory_space<vmem>>, vector<32x32xf32>
    %cst_94 = arith.constant dense<0.000000e+00> : vector<8x32xf32>
    %204 = tpu.matmul %199, %203, %cst_94 {dimension_numbers = #tpu.dot_dimension_numbers<[1], [0], [0], [1], [0, 0, 1, 1], [], []>} : vector<8x32xf32>, vector<32x32xf32>, vector<8x32xf32> -> vector<8x32xf32>
    %c0_95 = arith.constant 0 : index
    %c0_96 = arith.constant 0 : index
    %205 = vector.load %arg16[%c0_95, %c0_96] : memref<1x32xf32, #tpu.memory_space<vmem>>, vector<1x32xf32>
    %206 = vector.broadcast %205 : vector<1x32xf32> to vector<8x32xf32>
    %207 = arith.addf %204, %206 : vector<8x32xf32>
    %208 = arith.addf %207, %111 : vector<8x32xf32>
    %c0_97 = arith.constant 0 : index
    %c0_98 = arith.constant 0 : index
    %209 = vector.load %arg17[%c0_97, %c0_98] : memref<1x32xf32, #tpu.memory_space<vmem>>, vector<1x32xf32>
    %c0_99 = arith.constant 0 : index
    %c0_100 = arith.constant 0 : index
    %210 = vector.load %arg18[%c0_99, %c0_100] : memref<1x32xf32, #tpu.memory_space<vmem>>, vector<1x32xf32>
    %cst_101 = arith.constant dense<0.000000e+00> : vector<8x32xf32>
    %211 = tpu.matmul %208, %4, %cst_101 {dimension_numbers = #tpu.dot_dimension_numbers<[1], [0], [0], [1], [0, 0, 1, 1], [], []>} : vector<8x32xf32>, vector<32x32xf32>, vector<8x32xf32> -> vector<8x32xf32>
    %212 = arith.subf %208, %211 : vector<8x32xf32>
    %213 = arith.mulf %212, %212 : vector<8x32xf32>
    %cst_102 = arith.constant dense<0.000000e+00> : vector<8x32xf32>
    %214 = tpu.matmul %213, %4, %cst_102 {dimension_numbers = #tpu.dot_dimension_numbers<[1], [0], [0], [1], [0, 0, 1, 1], [], []>} : vector<8x32xf32>, vector<32x32xf32>, vector<8x32xf32> -> vector<8x32xf32>
    %cst_103 = arith.constant 9.99999974E-6 : f32
    %215 = vector.broadcast %cst_103 : f32 to vector<8x32xf32>
    %216 = arith.addf %214, %215 : vector<8x32xf32>
    %217 = math.rsqrt %216 : vector<8x32xf32>
    %218 = arith.mulf %212, %217 : vector<8x32xf32>
    %219 = vector.broadcast %209 : vector<1x32xf32> to vector<8x32xf32>
    %220 = arith.mulf %218, %219 : vector<8x32xf32>
    %221 = vector.broadcast %210 : vector<1x32xf32> to vector<8x32xf32>
    %222 = arith.addf %220, %221 : vector<8x32xf32>
    %c0_104 = arith.constant 0 : index
    %c0_105 = arith.constant 0 : index
    %223 = vector.load %arg19[%c0_104, %c0_105] : memref<32x64xf32, #tpu.memory_space<vmem>>, vector<32x64xf32>
    %cst_106 = arith.constant dense<0.000000e+00> : vector<8x64xf32>
    %224 = tpu.matmul %222, %223, %cst_106 {dimension_numbers = #tpu.dot_dimension_numbers<[1], [0], [0], [1], [0, 0, 1, 1], [], []>} : vector<8x32xf32>, vector<32x64xf32>, vector<8x64xf32> -> vector<8x64xf32>
    %c0_107 = arith.constant 0 : index
    %c0_108 = arith.constant 0 : index
    %225 = vector.load %arg20[%c0_107, %c0_108] : memref<1x64xf32, #tpu.memory_space<vmem>>, vector<1x64xf32>
    %226 = vector.broadcast %225 : vector<1x64xf32> to vector<8x64xf32>
    %227 = arith.addf %224, %226 : vector<8x64xf32>
    %cst_109 = arith.constant 0.000000e+00 : f32
    %228 = vector.broadcast %cst_109 : f32 to vector<8x64xf32>
    %229 = arith.maximumf %227, %228 : vector<8x64xf32>
    %c0_110 = arith.constant 0 : index
    %c0_111 = arith.constant 0 : index
    %230 = vector.load %arg21[%c0_110, %c0_111] : memref<64x32xf32, #tpu.memory_space<vmem>>, vector<64x32xf32>
    %cst_112 = arith.constant dense<0.000000e+00> : vector<8x32xf32>
    %231 = tpu.matmul %229, %230, %cst_112 {dimension_numbers = #tpu.dot_dimension_numbers<[1], [0], [0], [1], [0, 0, 1, 1], [], []>} : vector<8x64xf32>, vector<64x32xf32>, vector<8x32xf32> -> vector<8x32xf32>
    %c0_113 = arith.constant 0 : index
    %c0_114 = arith.constant 0 : index
    %232 = vector.load %arg22[%c0_113, %c0_114] : memref<1x32xf32, #tpu.memory_space<vmem>>, vector<1x32xf32>
    %233 = vector.broadcast %232 : vector<1x32xf32> to vector<8x32xf32>
    %234 = arith.addf %231, %233 : vector<8x32xf32>
    %235 = arith.addf %234, %222 : vector<8x32xf32>
    %c0_115 = arith.constant 0 : index
    %c0_116 = arith.constant 0 : index
    %236 = vector.load %arg23[%c0_115, %c0_116] : memref<1x32xf32, #tpu.memory_space<vmem>>, vector<1x32xf32>
    %c0_117 = arith.constant 0 : index
    %c0_118 = arith.constant 0 : index
    %237 = vector.load %arg24[%c0_117, %c0_118] : memref<1x32xf32, #tpu.memory_space<vmem>>, vector<1x32xf32>
    %cst_119 = arith.constant dense<0.000000e+00> : vector<8x32xf32>
    %238 = tpu.matmul %235, %4, %cst_119 {dimension_numbers = #tpu.dot_dimension_numbers<[1], [0], [0], [1], [0, 0, 1, 1], [], []>} : vector<8x32xf32>, vector<32x32xf32>, vector<8x32xf32> -> vector<8x32xf32>
    %239 = arith.subf %235, %238 : vector<8x32xf32>
    %240 = arith.mulf %239, %239 : vector<8x32xf32>
    %cst_120 = arith.constant dense<0.000000e+00> : vector<8x32xf32>
    %241 = tpu.matmul %240, %4, %cst_120 {dimension_numbers = #tpu.dot_dimension_numbers<[1], [0], [0], [1], [0, 0, 1, 1], [], []>} : vector<8x32xf32>, vector<32x32xf32>, vector<8x32xf32> -> vector<8x32xf32>
    %cst_121 = arith.constant 9.99999974E-6 : f32
    %242 = vector.broadcast %cst_121 : f32 to vector<8x32xf32>
    %243 = arith.addf %241, %242 : vector<8x32xf32>
    %244 = math.rsqrt %243 : vector<8x32xf32>
    %245 = arith.mulf %239, %244 : vector<8x32xf32>
    %246 = vector.broadcast %236 : vector<1x32xf32> to vector<8x32xf32>
    %247 = arith.mulf %245, %246 : vector<8x32xf32>
    %248 = vector.broadcast %237 : vector<1x32xf32> to vector<8x32xf32>
    %249 = arith.addf %247, %248 : vector<8x32xf32>
    %c0_122 = arith.constant 0 : index
    %c0_123 = arith.constant 0 : index
    %c0_124 = arith.constant 0 : index
    %250 = vector.load %arg26[%c0_122, %c0_123, %c0_124] : memref<1x8x32xf32, #tpu.memory_space<vmem>>, vector<1x8x32xf32>
    %251 = vector.shape_cast %250 : vector<1x8x32xf32> to vector<8x32xf32>
    %252 = vector.shape_cast %249 : vector<8x32xf32> to vector<1x8x32xf32>
    tpu.vector_store %arg26[%c0_122, %c0_123, %c0_124], %252 {strides = array<i32>} : memref<1x8x32xf32, #tpu.memory_space<vmem>>, vector<1x8x32xf32>,
    return
  }
  func.func @transform_0(%arg0: i32) -> (i32, i32, i32) {
    %c0_i32 = arith.constant 0 : i32
    %c0_i32_0 = arith.constant 0 : i32
    %c0_i32_1 = arith.constant 0 : i32
    return %arg0, %c0_i32, %c0_i32_0 : i32, i32, i32
  }
  func.func @transform_1(%arg0: i32) -> (i32, i32, i32) {
    %c0_i32 = arith.constant 0 : i32
    %c0_i32_0 = arith.constant 0 : i32
    %c0_i32_1 = arith.constant 0 : i32
    return %arg0, %c0_i32, %c0_i32_0 : i32, i32, i32
  }
  func.func @transform_2(%arg0: i32) -> (i32, i32, i32) {
    %c0_i32 = arith.constant 0 : i32
    %c0_i32_0 = arith.constant 0 : i32
    %c0_i32_1 = arith.constant 0 : i32
    return %arg0, %c0_i32, %c0_i32_0 : i32, i32, i32
  }
  func.func @transform_3(%arg0: i32) -> (i32, i32, i32) {
    %c0_i32 = arith.constant 0 : i32
    %c0_i32_0 = arith.constant 0 : i32
    %c0_i32_1 = arith.constant 0 : i32
    return %arg0, %c0_i32, %c0_i32_0 : i32, i32, i32
  }
  func.func @transform_4(%arg0: i32) -> (i32, i32) {
    %c0_i32 = arith.constant 0 : i32
    %c0_i32_0 = arith.constant 0 : i32
    %c0_i32_1 = arith.constant 0 : i32
    return %c0_i32, %c0_i32_0 : i32, i32
  }
  func.func @transform_5(%arg0: i32) -> (i32, i32) {
    %c0_i32 = arith.constant 0 : i32
    %c0_i32_0 = arith.constant 0 : i32
    %c0_i32_1 = arith.constant 0 : i32
    return %c0_i32, %c0_i32_0 : i32, i32
  }
  func.func @transform_6(%arg0: i32) -> (i32, i32) {
    %c0_i32 = arith.constant 0 : i32
    %c0_i32_0 = arith.constant 0 : i32
    %c0_i32_1 = arith.constant 0 : i32
    return %c0_i32, %c0_i32_0 : i32, i32
  }
  func.func @transform_7(%arg0: i32) -> (i32, i32) {
    %c0_i32 = arith.constant 0 : i32
    %c0_i32_0 = arith.constant 0 : i32
    %c0_i32_1 = arith.constant 0 : i32
    return %c0_i32, %c0_i32_0 : i32, i32
  }
  func.func @transform_8(%arg0: i32) -> (i32, i32) {
    %c0_i32 = arith.constant 0 : i32
    %c0_i32_0 = arith.constant 0 : i32
    %c0_i32_1 = arith.constant 0 : i32
    return %c0_i32, %c0_i32_0 : i32, i32
  }
  func.func @transform_9(%arg0: i32) -> (i32, i32) {
    %c0_i32 = arith.constant 0 : i32
    %c0_i32_0 = arith.constant 0 : i32
    %c0_i32_1 = arith.constant 0 : i32
    return %c0_i32, %c0_i32_0 : i32, i32
  }
  func.func @transform_10(%arg0: i32) -> (i32, i32) {
    %c0_i32 = arith.constant 0 : i32
    %c0_i32_0 = arith.constant 0 : i32
    %c0_i32_1 = arith.constant 0 : i32
    return %c0_i32, %c0_i32_0 : i32, i32
  }
  func.func @transform_11(%arg0: i32) -> (i32, i32) {
    %c0_i32 = arith.constant 0 : i32
    %c0_i32_0 = arith.constant 0 : i32
    %c0_i32_1 = arith.constant 0 : i32
    return %c0_i32, %c0_i32_0 : i32, i32
  }
  func.func @transform_12(%arg0: i32) -> (i32, i32) {
    %c0_i32 = arith.constant 0 : i32
    %c0_i32_0 = arith.constant 0 : i32
    %c0_i32_1 = arith.constant 0 : i32
    return %c0_i32, %c0_i32_0 : i32, i32
  }
  func.func @transform_13(%arg0: i32) -> (i32, i32) {
    %c0_i32 = arith.constant 0 : i32
    %c0_i32_0 = arith.constant 0 : i32
    %c0_i32_1 = arith.constant 0 : i32
    return %c0_i32, %c0_i32_0 : i32, i32
  }
  func.func @transform_14(%arg0: i32) -> (i32, i32) {
    %c0_i32 = arith.constant 0 : i32
    %c0_i32_0 = arith.constant 0 : i32
    %c0_i32_1 = arith.constant 0 : i32
    return %c0_i32, %c0_i32_0 : i32, i32
  }
  func.func @transform_15(%arg0: i32) -> (i32, i32) {
    %c0_i32 = arith.constant 0 : i32
    %c0_i32_0 = arith.constant 0 : i32
    %c0_i32_1 = arith.constant 0 : i32
    return %c0_i32, %c0_i32_0 : i32, i32
  }
  func.func @transform_16(%arg0: i32) -> (i32, i32) {
    %c0_i32 = arith.constant 0 : i32
    %c0_i32_0 = arith.constant 0 : i32
    %c0_i32_1 = arith.constant 0 : i32
    return %c0_i32, %c0_i32_0 : i32, i32
  }
  func.func @transform_17(%arg0: i32) -> (i32, i32) {
    %c0_i32 = arith.constant 0 : i32
    %c0_i32_0 = arith.constant 0 : i32
    %c0_i32_1 = arith.constant 0 : i32
    return %c0_i32, %c0_i32_0 : i32, i32
  }
  func.func @transform_18(%arg0: i32) -> (i32, i32) {
    %c0_i32 = arith.constant 0 : i32
    %c0_i32_0 = arith.constant 0 : i32
    %c0_i32_1 = arith.constant 0 : i32
    return %c0_i32, %c0_i32_0 : i32, i32
  }
  func.func @transform_19(%arg0: i32) -> (i32, i32) {
    %c0_i32 = arith.constant 0 : i32
    %c0_i32_0 = arith.constant 0 : i32
    %c0_i32_1 = arith.constant 0 : i32
    return %c0_i32, %c0_i32_0 : i32, i32
  }
  func.func @transform_20(%arg0: i32) -> (i32, i32) {
    %c0_i32 = arith.constant 0 : i32
    %c0_i32_0 = arith.constant 0 : i32
    %c0_i32_1 = arith.constant 0 : i32
    return %c0_i32, %c0_i32_0 : i32, i32
  }
  func.func @transform_21(%arg0: i32) -> (i32, i32) {
    %c0_i32 = arith.constant 0 : i32
    %c0_i32_0 = arith.constant 0 : i32
    %c0_i32_1 = arith.constant 0 : i32
    return %c0_i32, %c0_i32_0 : i32, i32
  }
  func.func @transform_22(%arg0: i32) -> (i32, i32) {
    %c0_i32 = arith.constant 0 : i32
    %c0_i32_0 = arith.constant 0 : i32
    %c0_i32_1 = arith.constant 0 : i32
    return %c0_i32, %c0_i32_0 : i32, i32
  }
  func.func @transform_23(%arg0: i32) -> (i32, i32) {
    %c0_i32 = arith.constant 0 : i32
    %c0_i32_0 = arith.constant 0 : i32
    %c0_i32_1 = arith.constant 0 : i32
    return %c0_i32, %c0_i32_0 : i32, i32
  }
  func.func @transform_24(%arg0: i32) -> (i32, i32) {
    %c0_i32 = arith.constant 0 : i32
    %c0_i32_0 = arith.constant 0 : i32
    %c0_i32_1 = arith.constant 0 : i32
    return %c0_i32, %c0_i32_0 : i32, i32
  }
  func.func @transform_25(%arg0: i32) -> (i32, i32, i32) {
    %c0_i32 = arith.constant 0 : i32
    %c0_i32_0 = arith.constant 0 : i32
    %c0_i32_1 = arith.constant 0 : i32
    return %arg0, %c0_i32, %c0_i32_0 : i32, i32, i32
  }
  func.func @transform_26(%arg0: i32) -> (i32, i32, i32) {
    %c0_i32 = arith.constant 0 : i32
    %c0_i32_0 = arith.constant 0 : i32
    %c0_i32_1 = arith.constant 0 : i32
    return %arg0, %c0_i32, %c0_i32_0 : i32, i32, i32
  }
  func.func @transform_27(%arg0: i32) -> (i32, i32, i32) {
    %c0_i32 = arith.constant 0 : i32
    %c0_i32_0 = arith.constant 0 : i32
    %c0_i32_1 = arith.constant 0 : i32
    return %arg0, %c0_i32, %c0_i32_0 : i32, i32, i32
  }
}

</mosaic_0001>

<bundles_post_ra>
// kernel: decoder_layer_forward.1
= control target key start
LH: loop header
LB: loop body
LE: loop exit
PB: predicated region body
PF: predicated region fallthrough
CT: control target
= control target key end

     0   :  { %s4030_s0 = inlined_call_operand.hbm [shape: f32[2,8,32], index: 0, kind: input, shape index: {}]   ;;  %s4031_s1 = inlined_call_operand.hbm [shape: f32[2,8,32], index: 1, kind: input, shape index: {}]   ;;  %s4032_s2 = inlined_call_operand.hbm [shape: s32[2,8,8], index: 2, kind: input, shape index: {}]   ;;  %s4033_s3 = inlined_call_operand.hbm [shape: s32[2,8,8], index: 3, kind: input, shape index: {}]   ;;  %s4034_s4 = inlined_call_operand.vmem [shape: f32[32,96], index: 4, kind: input, shape index: {}]   ;;  %s4035_s5 = inlined_call_operand.vmem [shape: f32[1,96], index: 5, kind: input, shape index: {}]   ;;  %s4036_s6 = inlined_call_operand.vmem [shape: f32[32,32], index: 6, kind: input, shape index: {}]   ;;  %s4037_s7 = inlined_call_operand.vmem [shape: f32[1,32], index: 7, kind: input, shape index: {}]   ;;  %s4038_s8 = inlined_call_operand.vmem [shape: f32[1,32], index: 8, kind: input, shape index: {}]   ;;  %s4039_s9 = inlined_call_operand.vmem [shape: f32[1,32], index: 9, kind: input, shape index: {}]   ;;  %s4040_s10 = inlined_call_operand.vmem [shape: f32[32,32], index: 10, kind: input, shape index: {}]   ;;  %s4041_s11 = inlined_call_operand.vmem [shape: f32[1,32], index: 11, kind: input, shape index: {}]   ;;  %s4042_s12 = inlined_call_operand.hbm [shape: f32[32,64], index: 12, kind: input, shape index: {}]   ;;  %s4043_s13 = inlined_call_operand.vmem [shape: f32[1,64], index: 13, kind: input, shape index: {}]   ;;  %s4044_s14 = inlined_call_operand.hbm [shape: f32[32,32], index: 14, kind: input, shape index: {}]   ;;  %s4045_s15 = inlined_call_operand.vmem [shape: f32[1,32], index: 15, kind: input, shape index: {}]   ;;  %s4046_s16 = inlined_call_operand.vmem [shape: f32[1,32], index: 16, kind: input, shape index: {}]   ;;  %s4047_s17 = inlined_call_operand.hbm [shape: f32[1,32], index: 17, kind: input, shape index: {}]   ;;  %s4048_s18 = inlined_call_operand.hbm [shape: f32[32,64], index: 18, kind: input, shape index: {}]   ;;  %s4049_s19 = inlined_call_operand.hbm [shape: f32[1,64], index: 19, kind: input, shape index: {}]   ;;  %s4050_s20 = inlined_call_operand.vmem [shape: f32[64,32], index: 20, kind: input, shape index: {}]   ;;  %s4051_s21 = inlined_call_operand.hbm [shape: f32[1,32], index: 21, kind: input, shape index: {}]   ;;  %s4052_s22 = inlined_call_operand.vmem [shape: f32[1,32], index: 22, kind: input, shape index: {}]   ;;  %s4053_s23 = inlined_call_operand.hbm [shape: f32[1,32], index: 23, kind: input, shape index: {}]   ;;  %s4054_s24 = inlined_call_operand.hbm [shape: f32[32,32], index: 24, kind: input, shape index: {}]   ;;  %s4055_s25 = inlined_call_operand.hbm [shape: f32[2,8,32], index: 25, kind: output, shape index: {0}]   ;;  %s4056_s26 = inlined_call_operand.vmem [shape: f32[2,8,32], index: 26, kind: output, shape index: {1}]   ;;  %s4057_s27 = inlined_call_operand.vmem [shape: f32[2,8,32], index: 27, kind: output, shape index: {2}]  }
   0x1   :  { %4085 = sst [smem:[#allocation37_spill]] %s4030_s0 }
   0x2   :  { %4086 = sst [smem:[#allocation38_spill]] %s4031_s1 }
   0x3   :  { %4087 = sst [smem:[#allocation39_spill]] %s4032_s2 }
   0x4   :  { %4088 = sst [smem:[#allocation40_spill]] %s4033_s3 }
   0x5   :  { %4089 = sst [smem:[#allocation41_spill]] %s4034_s4 }
   0x6   :  { %4090 = sst [smem:[#allocation42_spill]] %s4035_s5 }
   0x7   :  { %4091 = sst [smem:[#allocation43_spill]] %s4036_s6 }
   0x8   :  { %4092 = sst [smem:[#allocation44_spill]] %s4037_s7 }
   0x9   :  { %4093 = sst [smem:[#allocation45_spill]] %s4038_s8 }
   0xa   :  { %4094 = sst [smem:[#allocation46_spill]] %s4039_s9 }
   0xb   :  { %4095 = sst [smem:[#allocation47_spill]] %s4040_s10 }
   0xc   :  { %4096 = sst [smem:[#allocation48_spill]] %s4041_s11 }
   0xd   :  { %4097 = sst [smem:[#allocation49_spill]] %s4042_s12 }
   0xe   :  { %4098 = sst [smem:[#allocation50_spill]] %s4044_s14 }
   0xf   :  { %4099 = sst [smem:[#allocation51_spill]] %s4045_s15 }
  0x10   :  { %4100 = sst [smem:[#allocation52_spill]] %s4046_s16 }
  0x11   :  { %4101 = sst [smem:[#allocation53_spill]] %s4047_s17 }
  0x12   :  { %4102 = sst [smem:[#allocation54_spill]] %s4048_s18 }
  0x13   :  { %4103 = sst [smem:[#allocation55_spill]] %s4049_s19 }
  0x14   :  { %4104 = sst [smem:[#allocation56_spill]] %s4050_s20 }
  0x15   :  { %4105 = sst [smem:[#allocation57_spill]] %s4051_s21 }
  0x16   :  { %4106 = sst [smem:[#allocation58_spill]] %s4052_s22 }
  0x17   :  { %4107 = sst [smem:[#allocation59_spill]] %s4055_s25 }
  0x18   :  { %4108 = sst [smem:[#allocation60_spill]] %s4057_s27 }
  0x19   :  { %33 = vsyncpa [#allocation3], 0 }
  0x1a   :  { %35 = vsyncpa [#allocation3 + $0x1], 0 }
  0x1b   :  { %36 = vsyncpa [#allocation6], 0 }
  0x1c   :  { %38 = vsyncpa [#allocation6 + $0x1], 0 }
  0x1d   :  { %39 = vsyncpa [#allocation9], 0 }
  0x1e   :  { %41 = vsyncpa [#allocation9 + $0x1], 0 }
  0x1f   :  { %42 = vsyncpa [#allocation12], 0 }
  0x20   :  { %43 = vsyncpa [#allocation15], 0 }
  0x21   :  { %44 = vsyncpa [#allocation18], 0 }
  0x22   :  { %45 = vsyncpa [#allocation21], 0 }
  0x23   :  { %46 = vsyncpa [#allocation4], 0 }
  0x24   :  { %48 = vsyncpa [#allocation4 + $0x1], 0  ;;  %s3423_s7 = smov 0   ;;  %s3425_s4 = smov 0  }
  0x25   :  { %s3427_s8 = smov 0   ;;  %s3429_s30 = smov 0  }
  0x26 LB: > { %4109 = sst [smem:[#allocation32_spill]] %s3245_s7  ;;  %s3447_s0 = sadd.s32 4294967295, %s3257_s30   ;;  %s3257_s30 = sphi %s3429_s30, %s4167_s30   ;;  %s3253_s8 = sphi %s3427_s8, %s4171_s8   ;;  %s3249_s4 = sphi %s3425_s4, %s4170_s4   ;;  %s3245_s7 = sphi %s3423_s7, %s4169_s7  }
  0x27   : > { %s4110_s12 = sld [smem:[#allocation49_spill]]  ;;  %p2519_p0 = scmp.ge.s32.totalorder %s3257_s30, 1 }
  0x28   : > { %p4075_p1 = scmp.eq.s32.totalorder %s3447_s0, 0  ;;  %p682_p2 = scmp.lt.s32.totalorder %s3257_s30, 3 }
  0x29   : > { %s3259_s29 = smov [#allocation10]   ;;  %s4112_s14 = sld [smem:[#allocation50_spill]] }
  0x2a   : > { %p3452_p3 = pnand %p2519_p0, %p682_p2  ;;  %s719_s1 = sshll.u32 %s3259_s29, 4  ;;  %s720_s1 = int_to_ptr.vmem [resolvable:$true] %s719_s1 }
  0x2b   : > { %s4114_s18 = sld [smem:[#allocation54_spill]]  ;;  %s4066_s22 = smov 128  }
  0x2c   : > { %p2636_p4 = pneg %p3452_p3  ;;  %s4067_s6 = smov 8  }
  0x2d   : > { %s717_s28 = sshll.u32 %s4110_s12, 4  ;;  %s3260_s12 = smov [#allocation11]   ;;  %s718_s28 = int_to_ptr.hbm [resolvable:$true] %s717_s28 }
  0x2e   : > { %p3464_p6 = pnand %p2636_p4, %p4075_p1  ;;  %s736_s25 = sshll.u32 %s3260_s12, 4  ;;  %s737_s25 = int_to_ptr.vmem [resolvable:$true] %s736_s25 }
  0x2f   : > { %s734_s2 = sshll.u32 %s4112_s14, 4  ;;  %s4115_s21 = sld [smem:[#allocation57_spill]]  ;;  %s735_s2 = int_to_ptr.hbm [resolvable:$true] %s734_s2 }
  0x30   : > { %2639 = dma.hbm_to_vmem [thread:$0]  (!%p3464_p6), %s718_s28, 512, %s720_s1, [#allocation9], %s4066_s22, %s4066_s22, %s4067_s6  }
  0x31   : > { %s766_s29 = sshll.u32 %s4114_s18, 4  ;;  %s3263_s5 = smov [#allocation14]   ;;  %s767_s29 = int_to_ptr.hbm [resolvable:$true] %s766_s29 }
  0x32   : > { %2642 = dma.hbm_to_vmem [thread:$0]  (!%p3464_p6), %s735_s2, 512, %s737_s25, [#allocation12], %s4066_s22, %s4066_s22, %s4067_s6  }
  0x33   : > { %s768_s28 = sshll.u32 %s3263_s5, 4  ;;  %s3264_s25 = smov [#allocation17]   ;;  %s769_s28 = int_to_ptr.vmem [resolvable:$true] %s768_s28 }
  0x34   : > { %2648 = dma.hbm_to_vmem [thread:$0]  (!%p3464_p6), %s767_s29, 512, %s769_s28, [#allocation15], %s4066_s22, %s4066_s22, %s4067_s6  }
  0x35   : > { %s796_s9 = sshll.u32 %s4115_s21, 4  ;;  %s798_s1 = sshll.u32 %s3264_s25, 4  ;;  %s797_s9 = int_to_ptr.hbm [resolvable:$true] %s796_s9  ;;  %s799_s1 = int_to_ptr.vmem [resolvable:$true] %s798_s1 }
  0x36   : > { %2654 = dma.hbm_to_vmem [thread:$0]  (!%p3464_p6), %s797_s9, 16, %s799_s1, [#allocation18]  }
  0x37   : > { %s2518_s2 = sadd.s32 4294967294, %s3257_s30   ;;  %s3493_s12 = sadd.s32 1, %s3257_s30  }
  0x38   : > { %4116 = sst [smem:[#allocation33_spill]] %s3493_s12  ;;  %s58_s11 = ssub.s32 %s3257_s30, %s3493_s12 }
  0x39   : > { %s61_s5 = sadd.s32 1, %s3253_s8  ;;  %p59_p7 = scmp.eq.s32.totalorder %s58_s11, 0 }
  0x3a   : > { %p68_p8 = scmp.ne.s32.totalorder %s3253_s8, %s3249_s4  ;;  %p69_p9 = scmp.eq.s32.totalorder %s3257_s30, 0 }
  0x3b   : > { %p74_p10 = scmp.ne.s32.totalorder %s3249_s4, %s3245_s7  ;;  %p617_p13 = scmp.eq.s32.totalorder %s3447_s0, 1 }
  0x3c   : > { %s3504_s29 = scalar_select %p59_p7, %s3253_s8, %s61_s5  }
  0x3d   : > { %p70_p11 = por %p69_p9, %p68_p8  ;;  %p3508_p12 = por %p4075_p1, %p74_p10 }
  0x3e   : > { %4117 = sst [smem:[#allocation34_spill]] %s3504_s29  ;;  %p623_p0 = scmp.eq.s32.totalorder %s2518_s2, 1 }
  0x3f   : > { %p2686_p2 = scmp.lt.s32.totalorder %s3257_s30, 2  ;;  %s4071_s9 = sand.u32 1, %s3253_s8  }
  0x40   : > { %p3515_p4 = por %p617_p13, %p68_p8  ;;  %p3519_p5 = por %p623_p0, %p74_p10 }
  0x41   : > { %s3525_s11 = sshll.u32 %s4071_s9, 3  ;;  %s3528_s5 = sshll.u32 %s3257_s30, 3 }
  0x42   : > { %s4119_s25 = scalar_select %p3515_p4, 1, 0 }
  0x43   : > { %s4121_s1 = scalar_select %p3519_p5, 1, 0 }
  0x44   : > { %4120 = sst [smem:[#allocation35_spill]] %s4119_s25  ;;  %p3530_p7 = pnand %p2686_p2, %p70_p11 }
  0x45   : > { %4122 = sst [smem:[#allocation36_spill]] %s4121_s1  ;;  %s4076_s2 = sand.u32 1, %s3257_s30  }
  0x46   : > { %s4124_s18 = sld [smem:[#allocation38_spill]]  ;;  %s861_s12 = scalar_lea.vmem [#allocation5], %s3525_s11 }
  0x47   : > { %s869_s1 = sshll.u32 %s861_s12, 4  ;;  %s3542_s9 = scalar_lea.sflag [#allocation6], %s4076_s2  ;;  %s870_s1 = int_to_ptr.vmem [resolvable:$true] %s869_s1 }
  0x48   : > { %p2927_p9 = pneg %p3530_p7 }
  0x4c   : > { %s865_s21 = scalar_lea.hbm %s4124_s18, %s3528_s5 }
  0x4d   : > { %s867_s29 = sshll.u32 %s865_s21, 4  ;;  %s2930_s21 = scalar_lea.hbm %s4124_s18, 16  ;;  %s868_s29 = int_to_ptr.hbm [resolvable:$true] %s867_s29 }
  0x4e   : > { %s2923_s7 = sshra.s32 %s868_s29, 4  ;;  %s2924_s7 = int_to_ptr.hbm [resolvable:$true] %s2923_s7 }
  0x4f   : > { %s2925_s25 = scalar_lea.hbm %s2924_s7, 8  ;;  %p2931_p13 = scmp.lt.s32.totalorder %s2924_s7, %s4124_s18 }
  0x50   : > { %p2926_p8 = scmp.ne.s32.totalorder %s2924_s7, %s2925_s25  ;;  %p2932_p0 = scmp.lt.s32.totalorder %s2930_s21, %s2925_s25 }
  0x52   : > { %p2928_p10 = pnand %p2927_p9, %p2926_p8  ;;  %p2933_p2 = por %p2932_p0, %p2931_p13 }
  0x54   : > { %p2929_p11 = pneg %p2928_p10 }
  0x56   : > { %p2934_p1 = pnand %p2933_p2, %p2929_p11 }
  0x58   : > { %2937 = shalt.err (!%p2934_p1)
}
  0x59   : > { %2667 = dma.hbm_to_vmem [thread:$0]  (!%p3530_p7), %s868_s29, 128, %s870_s1, %s3542_s9  }
  0x5a   : > { %s4125_s17 = sld [smem:[#allocation53_spill]]  ;;  %s3265_s14 = smov [#allocation13]  }
  0x5b   : > { %s757_s6 = sshll.u32 %s3265_s14, 4  ;;  %s4126_s19 = sld [smem:[#allocation55_spill]]  ;;  %s758_s6 = int_to_ptr.vmem [resolvable:$true] %s757_s6 }
  0x5c   : > { %s811_s29 = sshll.u32 %s4053_s23, 4  ;;  %s3266_s20 = smov [#allocation16]   ;;  %s812_s29 = int_to_ptr.hbm [resolvable:$true] %s811_s29 }
  0x5d   : > { %s783_s1 = sshll.u32 %s3266_s20, 4  ;;  %s3267_s27 = smov [#allocation19]   ;;  %s784_s1 = int_to_ptr.vmem [resolvable:$true] %s783_s1 }
  0x5e   : > { %s813_s2 = sshll.u32 %s3267_s27, 4  ;;  %s4127_s20 = sld [smem:[#allocation37_spill]]  ;;  %s814_s2 = int_to_ptr.vmem [resolvable:$true] %s813_s2 }
  0x5f   : > { %2657 = dma.hbm_to_vmem [thread:$0]  (!%p3464_p6), %s812_s29, 16, %s814_s2, [#allocation18]  }
  0x60   : > { %s755_s15 = sshll.u32 %s4125_s17, 4  ;;  %s842_s12 = scalar_lea.vmem [#allocation2], %s3525_s11  ;;  %s756_s15 = int_to_ptr.hbm [resolvable:$true] %s755_s15 }
  0x61   : > { %s781_s7 = sshll.u32 %s4126_s19, 4  ;;  %s850_s14 = sshll.u32 %s842_s12, 4  ;;  %s782_s7 = int_to_ptr.hbm [resolvable:$true] %s781_s7  ;;  %s851_s14 = int_to_ptr.vmem [resolvable:$true] %s850_s14 }
  0x62   : > { %2645 = dma.hbm_to_vmem [thread:$0]  (!%p3464_p6), %s756_s15, 16, %s758_s6, [#allocation12]  }
  0x63   : > { %2651 = dma.hbm_to_vmem [thread:$0]  (!%p3464_p6), %s782_s7, 16, %s784_s1, [#allocation15]  }
  0x64   : > { %s822_s15 = sshll.u32 %s4054_s24, 4  ;;  %s3268_s6 = smov [#allocation20]   ;;  %s823_s15 = int_to_ptr.hbm [resolvable:$true] %s822_s15 }
  0x65   : > { %s824_s16 = sshll.u32 %s3268_s6, 4  ;;  %s846_s17 = scalar_lea.hbm %s4127_s20, %s3528_s5  ;;  %s825_s16 = int_to_ptr.vmem [resolvable:$true] %s824_s16 }
  0x66   : > { %s4128_s7 = smov 8   ;;  %s4129_s1 = smov 128  }
  0x67   : > { %2660 = dma.hbm_to_vmem [thread:$0]  (!%p3464_p6), %s823_s15, 512, %s825_s16, [#allocation21], %s4129_s1, %s4129_s1, %s4128_s7  }
  0x68   : > { %s848_s27 = sshll.u32 %s846_s17, 4  ;;  %s4130_s18 = sand.u32 1, %s3253_s8   ;;  %s849_s27 = int_to_ptr.hbm [resolvable:$true] %s848_s27 }
  0x69   : > { %s839_s29 = scalar_lea.sflag [#allocation3], %s4130_s18  ;;  %s3073_s2 = sshra.s32 %s849_s27, 4  ;;  %s3074_s2 = int_to_ptr.hbm [resolvable:$true] %s3073_s2 }
  0x6a   : > { %s3075_s6 = scalar_lea.hbm %s3074_s2, 8  ;;  %s3080_s21 = scalar_lea.hbm %s4127_s20, 16 }
  0x6b   : > { %p3076_p1 = scmp.ne.s32.totalorder %s3074_s2, %s3075_s6  ;;  %p3081_p6 = scmp.lt.s32.totalorder %s3074_s2, %s4127_s20 }
  0x6c   : > { %p3082_p11 = scmp.lt.s32.totalorder %s3080_s21, %s3075_s6 }
  0x6d   : > { %p3078_p8 = pnand %p3076_p1, %p2927_p9 }
  0x6e   : > { %p3083_p13 = por %p3082_p11, %p3081_p6 }
  0x6f   : > { %p3079_p10 = pneg %p3078_p8 }
  0x71   : > { %p3084_p0 = pnand %p3083_p13, %p3079_p10 }
  0x73   : > { %3087 = shalt.err (!%p3084_p0)
}
  0x74   : > { %2664 = dma.hbm_to_vmem [thread:$0]  (!%p3530_p7), %s849_s27, 128, %s851_s14, %s839_s29  }
  0x75   : > { %s4131_s7 = sld [smem:[#allocation39_spill]]  ;;  %s880_s25 = scalar_lea.vmem [#allocation7], %s3525_s11 }
  0x76   : > { %s888_s19 = sshll.u32 %s880_s25, 4  ;;  %s889_s19 = int_to_ptr.vmem [resolvable:$true] %s888_s19 }
  0x7b   : > { %s4132_s1 = smov %s4131_s7  ;;  %s884_s12 = scalar_lea.hbm %s4131_s7, %s3528_s5 }
  0x7c   : > { %s886_s3 = sshll.u32 %s884_s12, 4  ;;  %s3110_s27 = scalar_lea.hbm %s4132_s1, 16  ;;  %s887_s3 = int_to_ptr.hbm [resolvable:$true] %s886_s3 }
  0x7d   : > { %s3103_s2 = sshra.s32 %s887_s3, 4  ;;  %s3104_s2 = int_to_ptr.hbm [resolvable:$true] %s3103_s2 }
  0x7e   : > { %s3105_s6 = scalar_lea.hbm %s3104_s2, 8  ;;  %p3111_p10 = scmp.lt.s32.totalorder %s3104_s2, %s4132_s1 }
  0x7f   : > { %p3106_p2 = scmp.ne.s32.totalorder %s3104_s2, %s3105_s6  ;;  %p3112_p6 = scmp.lt.s32.totalorder %s3110_s27, %s3105_s6 }
  0x81   : > { %p3108_p1 = pnand %p3106_p2, %p2927_p9  ;;  %p3113_p11 = por %p3112_p6, %p3111_p10 }
  0x83   : > { %p3109_p8 = pneg %p3108_p1 }
  0x85   : > { %p3114_p13 = pnand %p3113_p11, %p3109_p8 }
  0x87   : > { %3117 = shalt.err (!%p3114_p13)
}
  0x88   : > { %2670 = dma.hbm_to_vmem [thread:$0]  (!%p3530_p7), %s887_s3, 128, %s889_s19, %s3542_s9  }
  0x89   : > { %s4133_s16 = sld [smem:[#allocation40_spill]]  ;;  %s899_s25 = scalar_lea.vmem [#allocation8], %s3525_s11 }
  0x8a   : > { %s907_s21 = sshll.u32 %s899_s25, 4  ;;  %s4134_s2 = sand.u32 1, %s3257_s30   ;;  %s908_s21 = int_to_ptr.vmem [resolvable:$true] %s907_s21 }
  0x8b   : > { %s896_s6 = scalar_lea.sflag [#allocation9], %s4134_s2 }
  0x8f   : > { %s903_s7 = scalar_lea.hbm %s4133_s16, %s3528_s5  ;;  %s3140_s3 = scalar_lea.hbm %s4133_s16, 16 }
  0x90   : > { %s905_s12 = sshll.u32 %s903_s7, 4  ;;  %s906_s12 = int_to_ptr.hbm [resolvable:$true] %s905_s12 }
  0x91   : > { %s3133_s15 = sshra.s32 %s906_s12, 4  ;;  %s3134_s15 = int_to_ptr.hbm [resolvable:$true] %s3133_s15 }
  0x92   : > { %s3135_s27 = scalar_lea.hbm %s3134_s15, 8  ;;  %p3141_p8 = scmp.lt.s32.totalorder %s3134_s15, %s4133_s16 }
  0x93   : > { %p3136_p0 = scmp.ne.s32.totalorder %s3134_s15, %s3135_s27  ;;  %p3142_p10 = scmp.lt.s32.totalorder %s3140_s3, %s3135_s27 }
  0x95   : > { %p3138_p2 = pnand %p3136_p0, %p2927_p9  ;;  %p3143_p6 = por %p3142_p10, %p3141_p8 }
  0x97   : > { %p3139_p1 = pneg %p3138_p2 }
  0x99   : > { %p3144_p11 = pnand %p3143_p6, %p3139_p1 }
  0x9b   : > { %3147 = shalt.err (!%p3144_p11)
}
  0x9c   : > { %2673 = dma.hbm_to_vmem [thread:$0]  (!%p3530_p7), %s906_s12, 128, %s908_s21, %s896_s6  }
  0x9d   : > { %916 = sbr.rel (%p3452_p3) target bundleno = 3416 (0xd58), region = 120  ;;  %s3637_s11 = sand.u32 (!%p3452_p3), 1, %s3249_s4  }
  0x9e   : > { %s3640_s29 = sshll.u32 (!%p3452_p3), %s3637_s11, 3  ;;  %s919_s17 = scalar_lea.sflag (!%p3452_p3), [#allocation3], %s3637_s11 }
  0x9f   : > { %s922_s18 = scalar_lea.vmem (!%p3452_p3), [#allocation2], %s3640_s29 }
  0xa2   : > { %3208 = dma.done.wait (%p3508_p12), %s919_s17, 128  }
  0xa3   : > { %3210 = vsyncadd (%p3508_p12), %s919_s17, 4294967168  ;;  %s928_s22 = sand.u32 1, %s3447_s0   ;;  %s932_s7 = scalar_lea.vmem [#allocation5], %s3640_s29 }
  0xa4   : > { %s929_s10 = scalar_lea.sflag [#allocation6], %s928_s22 }
  0xa5   : > { %3212 = dma.done.wait (%p3508_p12), %s929_s10, 256  }
  0xa6   : > { %3214 = vsyncadd (%p3508_p12), %s929_s10, 4294967040  ;;  %s942_s12 = scalar_lea.vmem [#allocation7], %s3640_s29  ;;  %s949_s25 = scalar_lea.sflag [#allocation9], %s928_s22 }
  0xa7   : > { %s952_s21 = scalar_lea.vmem [#allocation8], %s3640_s29 }
  0xa8   : > { %3216 = dma.done.wait (%p3508_p12), %s949_s25, 128  }
  0xa9   : > { %3218 = vsyncadd (%p3508_p12), %s949_s25, 4294967168  ;;  %p4135_p3 = scmp.eq.s32.totalorder %s3447_s0, 0 }
  0xab   : > { %3220 = dma.done.wait (%p4135_p3), [#allocation9], 512   ;;  %p4136_p7 = pmov %p4135_p3 }
  0xac   : > { %p4137_p9 = pmov %p4135_p3 }
  0xad   : > { %3222 = vsyncadd (%p4136_p7), [#allocation9], 4294966784 }
  0xae   : > { %3224 = dma.done.wait (%p4137_p9), [#allocation12], 528   ;;  %p4138_p13 = pmov %p4135_p3 }
  0xaf   : > { %p4139_p0 = pmov %p4135_p3 }
  0xb0   : > { %3226 = vsyncadd (%p4138_p13), [#allocation12], 4294966768 }
  0xb1   : > { %3228 = dma.done.wait (%p4139_p0), [#allocation15], 528   ;;  %p4140_p2 = pmov %p4139_p0 }
  0xb2   : > { %p4141_p12 = pmov %p4139_p0 }
  0xb3   : > { %3230 = vsyncadd (%p4140_p2), [#allocation15], 4294966768 }
  0xb4   : > { %3232 = dma.done.wait (%p4141_p12), [#allocation18], 32   ;;  %p4142_p1 = pmov %p4139_p0 }
  0xb5   : > { %p4143_p8 = pmov %p4139_p0 }
  0xb6   : > { %3234 = vsyncadd (%p4142_p1), [#allocation18], 4294967264 }
  0xb7   : > { %3236 = dma.done.wait (%p4143_p8), [#allocation21], 512   ;;  %p4144_p10 = pmov %p4139_p0 }
  0xb8   : > { %s4145_s6 = sld [smem:[#allocation41_spill]]  ;;  %vm1109_vm0 = vcmask 261120   ;;  %v3692_v4 = vld [vmem:[%s922_s18] sm:$0xff]  ;;  %s3269_s10 = smov 72   ;;  %vm1137_vm1 = vcmask 64512  }
  0xb9   : > { %3238 = vsyncadd (%p4144_p10), [#allocation21], 4294966784  ;;  %s4146_s22 = sld [smem:[#allocation42_spill]]  ;;  %s3270_s25 = smov 120   ;;  %v1133_v15 = vld [vmem:[%s942_s12] sm:$0xff] }
  0xba   : > { %s3271_s18 = smov 96   ;;  %s3272_s28 = smov 112   ;;  %vm1162_vm2 = vcmp.ne.s32.totalorder %v1133_v15, 0 }
  0xbb   : > { %s4079_s2 = smov 80   ;;  %s4080_s15 = smov 88  }
  0xbc   : > { %s3275_s27 = smov 104   ;;  %s3276_s12 = smov 56  }
  0xbd   : > { %s3277_s19 = smov 40   ;;  %s3278_s9 = smov 64  }
  0xbe   : > { %v1104_v0 = vld [vmem:[%s4145_s6 + $0x18] sm:$0xff]  ;;  %v1103_v1 = vld [vmem:[%s4145_s6 + $0x10] sm:$0xff]  ;;  %v1102_v2 = vld [vmem:[%s4145_s6 + $0x8] sm:$0xff]  ;;  %s3279_s3 = smov 48   ;;  %s4083_s5 = smov 8  }
  0xbf   : > { %1125 = vmatpush.msra.mxu0 %v1104_v0  ;;  %v1101_v3 = vld [vmem:[%s4145_s6] sm:$0xff]  ;;  %s4081_s14 = smov 24   ;;  %s3282_s17 = smov 16  }
  0xc0   : > { %v2752_v5 = vld [vmem:[%s4146_s22] ss:$0 sm:$0xff]  ;;  %p1087_p6 = scmp.lt.s32.totalorder %s3447_s0, 1  ;;  %s4162_s22 = sld [smem:[#allocation59_spill]] }
  0xc1   : > { %1126 = vmatpush.msra.mxu0 %v1103_v1 }
  0xc3   : > { %1127 = vmatpush.msra.mxu0 %v1102_v2 }
  0xc5   : > { %1128 = vmatpush.msra.mxu0 %v1101_v3 }
  0xc6   : > { %2553 = vmatmul.msk.f32.vlgmr.msra.gmra.mxu0 %vm1109_vm0, %v3692_v4 }
 0x143   : > { %v1130_v6 = vpop.f32.mrf.mxu0 }
 0x144   : > { %v3699_v7 = vadd.f32 %v2752_v5, %v1130_v6 }
 0x146   : > { %1374 = vrot.lane.b32.xlu2 %v3699_v7, %s3269_s10  ;;  %1214 = vrot.lane.b32.xlu1 %v3699_v7, %s3270_s25 }
 0x147   : > { %1135 = vrot.lane.b32.xlu0 %v3699_v7, %s3271_s18 }
 0x14e   : > { %1293 = vrot.lane.b32.xlu2 %v3699_v7, %s3272_s28  ;;  %1295 = vrot.lane.b32.xlu1 %v3699_v7, %s4079_s2 }
 0x14f   : > { %1216 = vrot.lane.b32.xlu0 %v3699_v7, %s4080_s15  ;;  %s4151_s15 = sld [smem:[#allocation46_spill]] }
 0x157   : > { %1372 = vrot.lane.b32.xlu0 %v3699_v7, %s3275_s27 }
 0x1a0   : > { %v1375_v8 = vpop.permute.xlu2 %1374 }
 0x1a1   : > { %2563 = vmatpush.xpose.msk.msrb.mxu0 %vm1137_vm1, %v1375_v8 }
 0x1a8   : > { %v1294_v13 = vpop.permute.xlu2 %1293 }
 0x1b8   : > { %v1215_v9 = vpop.permute.xlu1 %1214 }
 0x1b9   : > { %v1136_v10 = vpop.permute.xlu0 %1135 }
 0x1ba   : > { %2554 = vmatpush.xpose.msk.msra.mxu1 %vm1137_vm1, %v1136_v10 }
 0x1bd   : > { %2555 = vmatmul.msk.f32.vlgmr.msra.gmra.mxu1 %vm1137_vm1, %v3699_v7 }
 0x1c0   : > { %v1296_v11 = vpop.permute.xlu1 %1295 }
 0x1c1   : > { %v1217_v12 = vpop.permute.xlu0 %1216  ;;  %2560 = vmatpush.xpose.msk.msrb.mxu1 %vm1137_vm1, %v1296_v11 }
 0x1c2   : > { %2557 = vmatpush.xpose.msk.msra.mxu3 %vm1137_vm1, %v1217_v12 }
 0x1c5   : > { %2558 = vmatmul.msk.f32.vlgmr.msra.gmra.mxu3 %vm1137_vm1, %v1215_v9  ;;  %2561 = vmatmul.msk.f32.vlgmr.msrb.gmra.mxu1 %vm1137_vm1, %v1294_v13 }
 0x1c9   : > { %v1373_v14 = vpop.permute.xlu0 %1372 }
 0x1ca   : > { %2564 = vmatmul.msk.f32.vlgmr.msrb.gmra.mxu0 %vm1137_vm1, %v1373_v14 }
 0x23a   : > { %v1159_v16 = vpop.f32.mrf.mxu1 }
 0x23b   : > { %v1163_v17 = vsel %vm1162_vm2, -1e+09, %v1159_v16 }
 0x23c   : > { %v1164_v18 = vsel %vm1137_vm1, %v1163_v17, -inf }
 0x23d   : > { %1165 = vmax.xlane.f32.xlu1 %v1164_v18 }
 0x242   : > { %v1318_v19 = vpop.f32.mrf.mxu1 }
 0x243   : > { %v1321_v20 = vsel %vm1162_vm2, -1e+09, %v1318_v19 }
 0x244   : > { %v1322_v21 = vsel %vm1137_vm1, %v1321_v20, -inf }
 0x245   : > { %1323 = vmax.xlane.f32.xlu0 %v1322_v21 }
 0x247   : > { %v1397_v25 = vpop.f32.mrf.mxu0 }
 0x248   : > { %v1239_v22 = vpop.f32.mrf.mxu3  ;;  %v1400_v26 = vsel %vm1162_vm2, -1e+09, %v1397_v25 }
 0x249   : > { %v1242_v23 = vsel %vm1162_vm2, -1e+09, %v1239_v22  ;;  %v1401_v27 = vsel %vm1137_vm1, %v1400_v26, -inf }
 0x24a   : > { %v1243_v24 = vsel %vm1137_vm1, %v1242_v23, -inf }
 0x24b   : > { %1244 = vmax.xlane.f32.xlu2 %v1243_v24 }
 0x253   : > { %1402 = vmax.xlane.f32.xlu2 %v1401_v27 }
 0x259   : > { %1267 = vrot.lane.b32.xlu0 %v3699_v7, %s3276_s12  ;;  %s4149_s12 = sld [smem:[#allocation47_spill]] }
 0x2b0   : > { %v1166_v28 = vpop.xlane.xlu1 %1165 }
 0x2b1   : > { %v1167_v29 = vsub.f32 %v1163_v17, %v1166_v28 }
 0x2b3   : > { %v1168_v30 = vmul.f32 1.442695, %v1167_v29 }
 0x2b5   : > { %2765 = vpow2.f32 %v1168_v30 }
 0x2b8   : > { %v1324_v31 = vpop.xlane.xlu0 %1323 }
 0x2b9   : > { %v1325_v32 = vsub.f32 %v1321_v20, %v1324_v31 }
 0x2bb   : > { %v2766_v33 = vpop.eup %2765  ;;  %v1326_v34 = vmul.f32 1.442695, %v1325_v32 }
 0x2bc   : > { %v1170_v35 = vsel %vm1137_vm1, %v2766_v33, 0.0 }
 0x2bd   : > { %2767 = vpow2.f32 %v1326_v34  ;;  %1171 = vadd.xlane.f32.xlu1 %v1170_v35 }
 0x2be   : > { %v1245_v36 = vpop.xlane.xlu2 %1244 }
 0x2bf   : > { %v1246_v37 = vsub.f32 %v1242_v23, %v1245_v36 }
 0x2c1   : > { %v1247_v38 = vmul.f32 1.442695, %v1246_v37 }
 0x2c3   : > { %v3732_v39 = vpop.eup %2767  ;;  %2769 = vpow2.f32 %v1247_v38 }
 0x2c4   : > { %v1328_v40 = vsel %vm1137_vm1, %v3732_v39, 0.0 }
 0x2c5   : > { %1329 = vadd.xlane.f32.xlu0 %v1328_v40 }
 0x2c6   : > { %v1403_v41 = vpop.xlane.xlu2 %1402 }
 0x2c7   : > { %v1404_v42 = vsub.f32 %v1400_v26, %v1403_v41 }
 0x2c9   : > { %v3736_v43 = vpop.eup %2769  ;;  %v1405_v44 = vmul.f32 1.442695, %v1404_v42 }
 0x2ca   : > { %v1249_v45 = vsel %vm1137_vm1, %v3736_v43, 0.0 }
 0x2cb   : > { %2771 = vpow2.f32 %v1405_v44  ;;  %1250 = vadd.xlane.f32.xlu2 %v1249_v45  ;;  %v1268_v49 = vpop.permute.xlu0 %1267  ;;  %v3788_v45 = vld [vmem:[#allocation20 + $0x18] sm:$0xff] }
 0x2cc   : > { %1555 = vmatpush.msra.mxu0 %v3788_v45 }
 0x2d1   : > { %v3740_v46 = vpop.eup %2771 }
 0x2d2   : > { %v1407_v47 = vsel %vm1137_vm1, %v3740_v46, 0.0 }
 0x2d3   : > { %1408 = vadd.xlane.f32.xlu1 %v1407_v47 }
 0x2d9   : > { %1425 = vrot.lane.b32.xlu0 %v3699_v7, %s3277_s19  ;;  %s4147_s19 = sld [smem:[#allocation43_spill]] }
 0x2df   : > { %v1483_v42 = vld [vmem:[%s4147_s19 + $0x10] sm:$0xff]  ;;  %v1481_v44 = vld [vmem:[%s4147_s19] sm:$0xff] }
 0x2e3   : > { %1188 = vrot.lane.b32.xlu2 %v3699_v7, %s3278_s9  ;;  %s4150_s9 = sld [smem:[#allocation45_spill]] }
 0x2ec   : > { %1346 = vrot.lane.b32.xlu1 %v3699_v7, %s3279_s3  ;;  %s2591_s3 = sshll.u32 %s3447_s0, 3 }
 0x330   : > { %v1172_v48 = vpop.xlane.xlu1 %1171 }
 0x331   : > { %2773 = vrcp.f32 %v1172_v48  ;;  %v1184_v55 = vand.u32 2147483648, %v1172_v48  ;;  %vm1178_vm4 = vweird.f32 %v1172_v48  ;;  %v1182_v58 = vand.u32 2147483647, %v1172_v48 }
 0x333   : > { %v1185_v60 = vor.u32 1.1754944e-38, %v1184_v55  ;;  %vm1183_vm6 = vcmp.eq.f32.partialorder %v1182_v58, 8.507059e+37 }
 0x337   : > { %v2774_v50 = vpop.eup %2773 }
 0x338   : > { %v1174_v51 = vmul.f32 %v2774_v50, %v1172_v48  ;;  %v3747_v53 = vpop.xlane.xlu0 %1329  ;;  %vm1179_vm3 = vweird.f32 %v2774_v50 }
 0x339   : > { %2775 = vrcp.f32 %v3747_v53  ;;  %vm1180_vm5 = vmor %vm1178_vm4, %vm1179_vm3  ;;  %v1342_v26 = vand.u32 2147483648, %v3747_v53  ;;  %vm1336_vm15 = vweird.f32 %v3747_v53  ;;  %v1340_v28 = vand.u32 2147483647, %v3747_v53 }
 0x33a   : > { %v1175_v52 = vsub.f32 1.0, %v1174_v51 }
 0x33b   : > { %vm1341_vm4 = vcmp.eq.f32.partialorder %v1340_v28, 8.507059e+37 }
 0x33c   : > { %v1176_v54 = vmul.f32 %v2774_v50, %v1175_v52  ;;  %v3796_v52 = vld [vmem:[#allocation20 + $0x10] sm:$0xff] }
 0x33d   : > { %1556 = vmatpush.msra.mxu0 %v3796_v52 }
 0x33e   : > { %v1251_v56 = vpop.xlane.xlu2 %1250  ;;  %v1177_v57 = vadd.f32 %v2774_v50, %v1176_v54  ;;  %v3803_v54 = vld [vmem:[#allocation20] sm:$0xff] }
 0x33f   : > { %2777 = vrcp.f32 %v1251_v56  ;;  %v2776_v62 = vpop.eup %2775  ;;  %v1263_v7 = vand.u32 2147483648, %v1251_v56  ;;  %v1261_v9 = vand.u32 2147483647, %v1251_v56  ;;  %vm1257_vm8 = vweird.f32 %v1251_v56 }
 0x340   : > { %v1181_v59 = vsel %vm1180_vm5, %v2774_v50, %v1177_v57  ;;  %v1332_v5 = vmul.f32 %v2776_v62, %v3747_v53  ;;  %vm1337_vm12 = vweird.f32 %v2776_v62  ;;  %vm1461_vm5 = vcmask 130048   ;;  %v3800_v53 = vld [vmem:[#allocation20 + $0x8] sm:$0xff] }
 0x341   : > { %v1186_v61 = vsel %vm1183_vm6, %v1185_v60, %v1181_v59  ;;  %v1264_v14 = vor.u32 1.1754944e-38, %v1263_v7  ;;  %vm1262_vm10 = vcmp.eq.f32.partialorder %v1261_v9, 8.507059e+37  ;;  %vm1338_vm3 = vmor %vm1336_vm15, %vm1337_vm12  ;;  %vm1463_vm6 = vcmask 195584   ;;  %1557 = vmatpush.msra.mxu0 %v3800_v53  ;;  %v1582_v7 = vld [vmem:[%s4149_s12] sm:$0xff] }
 0x342   : > { %v3750_v3 = vmul.f32 %v2766_v33, %v1186_v61  ;;  %v1333_v11 = vsub.f32 1.0, %v1332_v5  ;;  %v1343_v33 = vor.u32 1.1754944e-38, %v1342_v26  ;;  %v1613_v5 = vld [vmem:[#allocation10] sm:$0xff] }
 0x343   : > { %1558 = vmatpush.msra.mxu0 %v3803_v54 }
 0x344   : > { %v1334_v18 = vmul.f32 %v2776_v62, %v1333_v11 }
 0x345   : > { %v2778_v63 = vpop.eup %2777 }
 0x346   : > { %v1253_v0 = vmul.f32 %v2778_v63, %v1251_v56  ;;  %v1409_v1 = vpop.xlane.xlu1 %1408  ;;  %v1189_v2 = vpop.permute.xlu2 %1188  ;;  %vm1258_vm7 = vweird.f32 %v2778_v63  ;;  %v1335_v24 = vadd.f32 %v2776_v62, %v1334_v18 }
 0x347   : > { %2779 = vrcp.f32 %v1409_v1  ;;  %1209 = vmatpush.msra.mxu2 %v1189_v2  ;;  %vm1259_vm9 = vmor %vm1257_vm8, %vm1258_vm7  ;;  %v1421_v21 = vand.u32 2147483648, %v1409_v1  ;;  %v1419_v23 = vand.u32 2147483647, %v1409_v1  ;;  %vm1415_vm13 = vweird.f32 %v1409_v1  ;;  %v1583_v2 = vld [vmem:[%s4149_s12 + $0x8] sm:$0xff] }
 0x348   : > { %v1254_v6 = vsub.f32 1.0, %v1253_v0  ;;  %2556 = vmatmul.msk.f32.vlgmr.msra.gmra.mxu2 %vm1137_vm1, %v3750_v3  ;;  %v1339_v32 = vsel %vm1338_vm3, %v2776_v62, %v1335_v24  ;;  %v1616_v62 = vld [vmem:[#allocation10 + $0x18] sm:$0xff]  ;;  %v1615_v0 = vld [vmem:[#allocation10 + $0x10] sm:$0xff] }
 0x349   : > { %1288 = vmatpush.msrb.mxu2 %v1268_v49  ;;  %v1422_v27 = vor.u32 1.1754944e-38, %v1421_v21  ;;  %vm1420_vm2 = vcmp.eq.f32.partialorder %v1419_v23, 8.507059e+37  ;;  %v1344_v34 = vsel %vm1341_vm4, %v1343_v33, %v1339_v32  ;;  %v2756_v23 = vld [vmem:[%s4043_s13] ss:$0 sm:$0xff] }
 0x34a   : > { %v1255_v8 = vmul.f32 %v2778_v63, %v1254_v6  ;;  %v3769_v36 = vmul.f32 %v3732_v39, %v1344_v34  ;;  %v1484_v39 = vld [vmem:[%s4147_s19 + $0x18] sm:$0xff] }
 0x34b   : > { %v1426_v10 = vpop.permute.xlu0 %1425  ;;  %1504 = vmatpush.msra.mxu1 %v1484_v39  ;;  %v1096_v6 = vld [vmem:[%s932_s7] sm:$0xff] }
 0x34c   : > { %v1256_v12 = vadd.f32 %v2778_v63, %v1255_v8  ;;  %1446 = vmatpush.msra.mxu2 %v1426_v10 }
 0x34d   : > { %v2780_v13 = vpop.eup %2779  ;;  %1505 = vmatpush.msra.mxu1 %v1483_v42 }
 0x34e   : > { %v1411_v15 = vmul.f32 %v2780_v13, %v1409_v1  ;;  %v1260_v16 = vsel %vm1259_vm9, %v2778_v63, %v1256_v12  ;;  %vm1416_vm11 = vweird.f32 %v2780_v13  ;;  %v1585_v63 = vld [vmem:[%s4149_s12 + $0x18] sm:$0xff]  ;;  %v1614_v1 = vld [vmem:[#allocation10 + $0x8] sm:$0xff] }
 0x34f   : > { %v1265_v17 = vsel %vm1262_vm10, %v1264_v14, %v1260_v16  ;;  %vm1417_vm14 = vmor %vm1415_vm13, %vm1416_vm11  ;;  %v2754_v16 = vld [vmem:[%s4150_s9] ss:$0 sm:$0xff]  ;;  %s4152_s9 = sld [smem:[#allocation48_spill]] }
 0x350   : > { %v1412_v19 = vsub.f32 1.0, %v1411_v15  ;;  %v3756_v20 = vmul.f32 %v3736_v43, %v1265_v17  ;;  %v1482_v43 = vld [vmem:[%s4147_s19 + $0x8] sm:$0xff] }
 0x351   : > { %1506 = vmatpush.msra.mxu1 %v1482_v43 }
 0x352   : > { %v1413_v22 = vmul.f32 %v2780_v13, %v1412_v19  ;;  %2559 = vmatmul.msk.f32.vlgmr.msrb.gmra.mxu2 %vm1137_vm1, %v3756_v20  ;;  %v2755_v19 = vld [vmem:[%s4151_s15] ss:$0 sm:$0xff] }
 0x353   : > { %1507 = vmatpush.msra.mxu1 %v1481_v44  ;;  %1605 = vmatpush.msrb.mxu2 %v1585_v63 }
 0x354   : > { %v1414_v25 = vadd.f32 %v2780_v13, %v1413_v22 }
 0x355   : > { %1636 = vmatpush.msrb.mxu1 %v1616_v62  ;;  %v2757_v26 = vld [vmem:[%s4152_s9] ss:$0 sm:$0xff]  ;;  %s4160_s9 = sld [smem:[#allocation52_spill]] }
 0x356   : > { %v1418_v29 = vsel %vm1417_vm14, %v2780_v13, %v1414_v25 }
 0x357   : > { %v1423_v30 = vsel %vm1420_vm2, %v1422_v27, %v1418_v29  ;;  %1637 = vmatpush.msrb.mxu1 %v1615_v0 }
 0x358   : > { %v3764_v31 = vmul.f32 %v3740_v46, %v1423_v30 }
 0x359   : > { %1638 = vmatpush.msrb.mxu1 %v1614_v1 }
 0x35a   : > { %2565 = vmatmul.msk.f32.vlgmr.msra.gmra.mxu2 %vm1137_vm1, %v3764_v31 }
 0x35b   : > { %1639 = vmatpush.msrb.mxu1 %v1613_v5 }
 0x35e   : > { %v1347_v35 = vpop.permute.xlu1 %1346 }
 0x35f   : > { %1367 = vmatpush.msrb.mxu3 %v1347_v35 }
 0x360   : > { %2562 = vmatmul.msk.f32.vlgmr.msrb.gmra.mxu3 %vm1137_vm1, %v3769_v36 }
 0x361   : > { %1530 = vmatpush.msra.mxu3 %v3788_v45 }
 0x363   : > { %1531 = vmatpush.msra.mxu3 %v3796_v52 }
 0x365   : > { %1532 = vmatpush.msra.mxu3 %v3800_v53 }
 0x367   : > { %1533 = vmatpush.msra.mxu3 %v3803_v54 }
 0x3cb   : > { %v1211_v37 = vpop.f32.mrf.mxu2 }
 0x3d5   : > { %v1290_v38 = vpop.f32.mrf.mxu2 }
 0x3d6   : > { %1466 = vrot.lane.b32.xlu2 %v1290_v38, %s4083_s5  ;;  %s4148_s5 = sld [smem:[#allocation44_spill]] }
 0x3dc   : > { %v2753_v55 = vld [vmem:[%s4148_s5] ss:$0 sm:$0xff]  ;;  %s4161_s5 = sld [smem:[#allocation58_spill]] }
 0x3dd   : > { %v1448_v40 = vpop.f32.mrf.mxu2 }
 0x3de   : > { %1474 = vrot.lane.b32.xlu0 %v1448_v40, %s4081_s14  ;;  %s4157_s14 = sld [smem:[#allocation60_spill]] }
 0x3e3   : > { %v1369_v41 = vpop.f32.mrf.mxu3 }
 0x3e4   : > { %1470 = vrot.lane.b32.xlu1 %v1369_v41, %s3282_s17 }
 0x430   : > { %v1467_v46 = vpop.permute.xlu2 %1466 }
 0x431   : > { %v1477_v47 = vsel %vm1137_vm1, %v1211_v37, %v1467_v46  ;;  %v1644_v37 = vld [vmem:[%s952_s21] sm:$0xff]  ;;  %s4153_s21 = smov 88  }
 0x432   : > { %vm1671_vm10 = vcmp.ne.s32.totalorder %v1644_v37, 0 }
 0x450   : > { %v1475_v49 = vpop.permute.xlu0 %1474 }
 0x456   : > { %v1471_v48 = vpop.permute.xlu1 %1470 }
 0x457   : > { %v1478_v50 = vsel %vm1461_vm5, %v1477_v47, %v1471_v48 }
 0x458   : > { %v1479_v51 = vsel %vm1463_vm6, %v1478_v50, %v1475_v49 }
 0x459   : > { %2566 = vmatmul.msk.f32.vlgmr.msra.gmra.mxu1 %vm1109_vm0, %v1479_v51 }
 0x461   : > { %2570 = vmatmul.msk.f32.vlgmr.msrb.gmra.mxu1 %vm1109_vm0, %v1096_v6 }
 0x4d6   : > { %v1509_v56 = vpop.f32.mrf.mxu1 }
 0x4d7   : > { %v1510_v57 = vadd.f32 %v2753_v55, %v1509_v56 }
 0x4d9   : > { %v1512_v58 = vadd.f32 %v1510_v57, %v3692_v4  ;;  %v1584_v4 = vld [vmem:[%s4149_s12 + $0x10] sm:$0xff] }
 0x4da   : > { %1606 = vmatpush.msrb.mxu2 %v1584_v4 }
 0x4db   : > { %2567 = vmatmul.msk.f32.vlgmr.msra.gmra.mxu3 %vm1109_vm0, %v1512_v58 }
 0x4dc   : > { %1607 = vmatpush.msrb.mxu2 %v1583_v2 }
 0x4de   : > { %1608 = vmatpush.msrb.mxu2 %v1582_v7  ;;  %v1641_v24 = vpop.f32.mrf.mxu1 }
 0x4df   : > { %v3842_v25 = vadd.f32 %v2756_v23, %v1641_v24 }
 0x4e1   : > { %1804 = vrot.lane.b32.xlu0 %v3842_v25, %s3272_s28  ;;  %1725 = vrot.lane.b32.xlu2 %v3842_v25, %s3270_s25 }
 0x4e2   : > { %2571 = vmatpush.xpose.msk.msrb.mxu3 %vm1137_vm1, %v3842_v25 }
 0x4e9   : > { %1883 = vrot.lane.b32.xlu2 %v3842_v25, %s3275_s27 }
 0x53b   : > { %v1726_v29 = vpop.permute.xlu2 %1725 }
 0x53c   : > { %2574 = vmatpush.xpose.msk.msra.mxu2 %vm1137_vm1, %v1726_v29 }
 0x543   : > { %v1884_v30 = vpop.permute.xlu2 %1883 }
 0x553   : > { %v1805_v32 = vpop.permute.xlu0 %1804 }
 0x554   : > { %2577 = vmatpush.xpose.msk.msra.mxu3 %vm1137_vm1, %v1805_v32 }
 0x55e   : > { %v1535_v59 = vpop.f32.mrf.mxu3 }
 0x55f   : > { %v1538_v60 = vsub.f32 %v1512_v58, %v1535_v59 }
 0x561   : > { %v1539_v61 = vmul.f32 %v1538_v60, %v1538_v60 }
 0x563   : > { %2568 = vmatmul.msk.f32.vlgmr.msra.gmra.mxu0 %vm1109_vm0, %v1539_v61 }
 0x5e0   : > { %v1560_v8 = vpop.f32.mrf.mxu0 }
 0x5e1   : > { %v1561_v9 = vadd.f32 1e-05, %v1560_v8 }
 0x5e3   : > { %2781 = vrsqrt.f32 %v1561_v9  ;;  %vm1569_vm8 = vweird.f32 %v1561_v9 }
 0x5e9   : > { %v2782_v10 = vpop.eup %2781 }
 0x5ea   : > { %v1564_v11 = vmul.f32 %v2782_v10, %v1561_v9  ;;  %vm1570_vm7 = vweird.f32 %v2782_v10 }
 0x5eb   : > { %vm1571_vm9 = vmor %vm1569_vm8, %vm1570_vm7 }
 0x5ec   : > { %v1565_v12 = vmul.f32 %v2782_v10, %v1564_v11 }
 0x5ee   : > { %v1566_v13 = vmul.f32 0.5, %v1565_v12 }
 0x5f0   : > { %v1567_v14 = vsub.f32 1.5, %v1566_v13 }
 0x5f2   : > { %v1568_v15 = vmul.f32 %v2782_v10, %v1567_v14 }
 0x5f4   : > { %v1572_v17 = vsel %vm1571_vm9, %v2782_v10, %v1568_v15 }
 0x5f5   : > { %v1573_v18 = vmul.f32 %v1572_v17, %v1538_v60 }
 0x5f7   : > { %v1577_v21 = vmul.f32 %v2754_v16, %v1573_v18 }
 0x5f9   : > { %v3835_v22 = vadd.f32 %v2755_v19, %v1577_v21 }
 0x5fb   : > { %2569 = vmatmul.msk.f32.vlgmr.msrb.gmra.mxu2 %vm1109_vm0, %v3835_v22 }
 0x5fc   : > { %2580 = vmatpush.xpose.msk.msrb.mxu2 %vm1137_vm1, %v1884_v30 }
 0x67e   : > { %v1610_v27 = vpop.f32.mrf.mxu2 }
 0x67f   : > { %v1611_v28 = vadd.f32 %v2757_v26, %v1610_v27 }
 0x681   : > { %1881 = vrot.lane.b32.xlu0 %v1611_v28, %s3275_s27  ;;  %1723 = vrot.lane.b32.xlu1 %v1611_v28, %s3270_s25  ;;  %s4154_s25 = smov 80  }
 0x682   : > { %2572 = vmatmul.msk.f32.vlgmr.msrb.gmra.mxu3 %vm1137_vm1, %v1611_v28 }
 0x689   : > { %1802 = vrot.lane.b32.xlu1 %v1611_v28, %s3272_s28  ;;  %s1088_s28 = scalar_select %p1087_p6, %s3447_s0, 1 }
 0x68a   : > { %s2229_s0 = scalar_lea.sflag [#allocation4], %s3637_s11 }
 0x68b   : > { %s2551_s27 = sshll.u32 %s1088_s28, 3 }
 0x68c   : > { %s1090_s2 = scalar_lea.vmem %s4056_s26, %s2551_s27  ;;  %s1094_s7 = scalar_lea.vmem %s4157_s14, %s2551_s27 }
 0x6f3   : > { %v1724_v33 = vpop.permute.xlu1 %1723  ;;  %v1882_v34 = vpop.permute.xlu0 %1881 }
 0x6f4   : > { %2575 = vmatmul.msk.f32.vlgmr.msra.gmra.mxu2 %vm1137_vm1, %v1724_v33 }
 0x6f5   : > { %2062 = vmatpush.msra.mxu2 %v3788_v45 }
 0x6f7   : > { %2063 = vmatpush.msra.mxu2 %v3796_v52 }
 0x6f9   : > { %2064 = vmatpush.msra.mxu2 %v3800_v53 }
 0x6fb   : > { %v1803_v35 = vpop.permute.xlu1 %1802  ;;  %2065 = vmatpush.msra.mxu2 %v3803_v54 }
 0x6fc   : > { %2578 = vmatmul.msk.f32.vlgmr.msra.gmra.mxu3 %vm1137_vm1, %v1803_v35  ;;  %2581 = vmatmul.msk.f32.vlgmr.msrb.gmra.mxu2 %vm1137_vm1, %v1882_v34 }
 0x6fd   : > { %2200 = vmatpush.msrb.mxu2 %v3788_v45 }
 0x6ff   : > { %2201 = vmatpush.msrb.mxu2 %v3796_v52 }
 0x701   : > { %2202 = vmatpush.msrb.mxu2 %v3800_v53 }
 0x703   : > { %2203 = vmatpush.msrb.mxu2 %v3803_v54 }
 0x705   : > { %v1668_v38 = vpop.f32.mrf.mxu3 }
 0x706   : > { %v1672_v40 = vsel %vm1671_vm10, -1e+09, %v1668_v38 }
 0x707   : > { %v1673_v41 = vsel %vm1137_vm1, %v1672_v40, -inf }
 0x708   : > { %1674 = vmax.xlane.f32.xlu2 %v1673_v41 }
 0x777   : > { %v1748_v39 = vpop.f32.mrf.mxu2 }
 0x778   : > { %v1751_v42 = vsel %vm1671_vm10, -1e+09, %v1748_v39 }
 0x779   : > { %v1752_v43 = vsel %vm1137_vm1, %v1751_v42, -inf }
 0x77a   : > { %1753 = vmax.xlane.f32.xlu1 %v1752_v43 }
 0x77b   : > { %v1675_v44 = vpop.xlane.xlu2 %1674 }
 0x77c   : > { %v1676_v46 = vsub.f32 %v1672_v40, %v1675_v44 }
 0x77e   : > { %v1677_v47 = vmul.f32 1.442695, %v1676_v46 }
 0x77f   : > { %v1827_v48 = vpop.f32.mrf.mxu3  ;;  %v1906_v49 = vpop.f32.mrf.mxu2 }
 0x780   : > { %2783 = vpow2.f32 %v1677_v47  ;;  %v1830_v50 = vsel %vm1671_vm10, -1e+09, %v1827_v48  ;;  %v1909_v51 = vsel %vm1671_vm10, -1e+09, %v1906_v49 }
 0x781   : > { %v1831_v55 = vsel %vm1137_vm1, %v1830_v50, -inf  ;;  %v1910_v56 = vsel %vm1137_vm1, %v1909_v51, -inf }
 0x782   : > { %1832 = vmax.xlane.f32.xlu0 %v1831_v55  ;;  %1911 = vmax.xlane.f32.xlu2 %v1910_v56 }
 0x786   : > { %v2784_v57 = vpop.eup %2783 }
 0x787   : > { %v1679_v58 = vsel %vm1137_vm1, %v2784_v57, 0.0 }
 0x788   : > { %1680 = vadd.xlane.f32.xlu1 %v1679_v58 }
 0x796   : > { %1697 = vrot.lane.b32.xlu0 %v3842_v25, %s3271_s18  ;;  %s4156_s18 = smov 24  }
 0x7ed   : > { %v1754_v59 = vpop.xlane.xlu1 %1753 }
 0x7ee   : > { %v1755_v60 = vsub.f32 %v1751_v42, %v1754_v59 }
 0x7f0   : > { %v1756_v61 = vmul.f32 1.442695, %v1755_v60 }
 0x7f2   : > { %2785 = vpow2.f32 %v1756_v61 }
 0x7f5   : > { %v1833_v62 = vpop.xlane.xlu0 %1832  ;;  %v1912_v63 = vpop.xlane.xlu2 %1911 }
 0x7f6   : > { %v1834_v0 = vsub.f32 %v1830_v50, %v1833_v62  ;;  %v1913_v4 = vsub.f32 %v1909_v51, %v1912_v63 }
 0x7f8   : > { %v3886_v1 = vpop.eup %2785  ;;  %v1835_v2 = vmul.f32 1.442695, %v1834_v0  ;;  %v1914_v5 = vmul.f32 1.442695, %v1913_v4 }
 0x7f9   : > { %v1758_v6 = vsel %vm1137_vm1, %v3886_v1, 0.0 }
 0x7fa   : > { %2787 = vpow2.f32 %v1835_v2  ;;  %1759 = vadd.xlane.f32.xlu0 %v1758_v6 }
 0x7fb   : > { %2789 = vpow2.f32 %v1914_v5  ;;  %v1681_v7 = vpop.xlane.xlu1 %1680 }
 0x7fc   : > { %2791 = vrcp.f32 %v1681_v7  ;;  %v1693_v15 = vand.u32 2147483648, %v1681_v7  ;;  %v1691_v17 = vand.u32 2147483647, %v1681_v7  ;;  %vm1687_vm12 = vweird.f32 %v1681_v7 }
 0x7fe   : > { %v1694_v21 = vor.u32 1.1754944e-38, %v1693_v15  ;;  %vm1692_vm14 = vcmp.eq.f32.partialorder %v1691_v17, 8.507059e+37 }
 0x800   : > { %v3890_v8 = vpop.eup %2787 }
 0x801   : > { %v3892_v9 = vpop.eup %2789  ;;  %v1837_v10 = vsel %vm1137_vm1, %v3890_v8, 0.0 }
 0x802   : > { %v2792_v11 = vpop.eup %2791  ;;  %1838 = vadd.xlane.f32.xlu2 %v1837_v10  ;;  %v1916_v12 = vsel %vm1137_vm1, %v3892_v9, 0.0 }
 0x803   : > { %v1683_v13 = vmul.f32 %v2792_v11, %v1681_v7  ;;  %1917 = vadd.xlane.f32.xlu1 %v1916_v12  ;;  %vm1688_vm11 = vweird.f32 %v2792_v11 }
 0x804   : > { %vm1689_vm13 = vmor %vm1687_vm12, %vm1688_vm11 }
 0x805   : > { %v1684_v14 = vsub.f32 1.0, %v1683_v13 }
 0x807   : > { %v1685_v16 = vmul.f32 %v2792_v11, %v1684_v14 }
 0x808   : > { %v1698_v18 = vpop.permute.xlu0 %1697 }
 0x809   : > { %v1686_v19 = vadd.f32 %v2792_v11, %v1685_v16  ;;  %1718 = vmatpush.msrb.mxu0 %v1698_v18 }
 0x80b   : > { %v1690_v23 = vsel %vm1689_vm13, %v2792_v11, %v1686_v19 }
 0x80c   : > { %v1695_v24 = vsel %vm1692_vm14, %v1694_v21, %v1690_v23 }
 0x80d   : > { %v3898_v26 = vmul.f32 %v2784_v57, %v1695_v24 }
 0x80e   : > { %1934 = vrot.lane.b32.xlu0 %v3842_v25, %s3269_s10  ;;  %s4155_s10 = smov 8  }
 0x80f   : > { %2573 = vmatmul.msk.f32.vlgmr.msrb.gmra.mxu0 %vm1137_vm1, %v3898_v26 }
 0x81a   : > { %1776 = vrot.lane.b32.xlu2 %v3842_v25, %s4153_s21  ;;  %s4158_s21 = sld [smem:[#allocation51_spill]] }
 0x81c   : > { %1855 = vrot.lane.b32.xlu1 %v3842_v25, %s4154_s25  ;;  %s1074_s25 = scalar_lea.vmem [#allocation22], %s3640_s29  ;;  %s3183_s29 = scalar_lea.hbm %s4162_s22, 16 }
 0x86d   : > { %v1760_v27 = vpop.xlane.xlu0 %1759 }
 0x86e   : > { %2793 = vrcp.f32 %v1760_v27  ;;  %v1772_v34 = vand.u32 2147483648, %v1760_v27  ;;  %v1770_v37 = vand.u32 2147483647, %v1760_v27  ;;  %vm1766_vm2 = vweird.f32 %v1760_v27 }
 0x870   : > { %v1773_v41 = vor.u32 1.1754944e-38, %v1772_v34  ;;  %vm1771_vm4 = vcmp.eq.f32.partialorder %v1770_v37, 8.507059e+37 }
 0x874   : > { %v2794_v28 = vpop.eup %2793 }
 0x875   : > { %v1762_v29 = vmul.f32 %v2794_v28, %v1760_v27  ;;  %v1839_v30 = vpop.xlane.xlu2 %1838  ;;  %vm1767_vm15 = vweird.f32 %v2794_v28 }
 0x876   : > { %v1918_v32 = vpop.xlane.xlu1 %1917  ;;  %2795 = vrcp.f32 %v1839_v30  ;;  %vm1768_vm3 = vmor %vm1766_vm2, %vm1767_vm15  ;;  %v1851_v61 = vand.u32 2147483648, %v1839_v30  ;;  %vm1845_vm12 = vweird.f32 %v1839_v30  ;;  %v1849_v63 = vand.u32 2147483647, %v1839_v30 }
 0x877   : > { %v1763_v33 = vsub.f32 1.0, %v1762_v29  ;;  %2797 = vrcp.f32 %v1918_v32  ;;  %v1930_v51 = vand.u32 2147483648, %v1918_v32  ;;  %v1928_v57 = vand.u32 2147483647, %v1918_v32 }
 0x878   : > { %vm1924_vm8 = vweird.f32 %v1918_v32  ;;  %v1852_v2 = vor.u32 1.1754944e-38, %v1851_v61  ;;  %vm1850_vm14 = vcmp.eq.f32.partialorder %v1849_v63, 8.507059e+37  ;;  %vm2133_vm15 = vcmask 523264  }
 0x879   : > { %v1764_v35 = vmul.f32 %v2794_v28, %v1763_v33  ;;  %v1931_v60 = vor.u32 1.1754944e-38, %v1930_v51  ;;  %vm1929_vm11 = vcmp.eq.f32.partialorder %v1928_v57, 8.507059e+37  ;;  %v2759_v57 = vld [vmem:[%s4160_s9] ss:$0 sm:$0xff]  ;;  %s2247_s9 = scalar_lea.hbm %s4162_s22, %s2591_s3 }
 0x87a   : > { %s2251_s28 = sshll.u32 %s2247_s9, 4  ;;  %s2252_s28 = int_to_ptr.hbm [resolvable:$true] %s2251_s28 }
 0x87b   : > { %v1765_v38 = vadd.f32 %v2794_v28, %v1764_v35  ;;  %s3177_s27 = sshra.s32 %s2252_s28, 4  ;;  %s3178_s27 = int_to_ptr.hbm [resolvable:$true] %s3177_s27 }
 0x87c   : > { %v2796_v40 = vpop.eup %2795  ;;  %p3184_p9 = scmp.lt.s32.totalorder %s3178_s27, %s4162_s22 }
 0x87d   : > { %v2798_v39 = vpop.eup %2797  ;;  %v1769_v25 = vsel %vm1768_vm3, %v2794_v28, %v1765_v38  ;;  %v1841_v42 = vmul.f32 %v2796_v40, %v1839_v30  ;;  %v1777_v43 = vpop.permute.xlu2 %1776  ;;  %vm1846_vm9 = vweird.f32 %v2796_v40  ;;  %v2758_v30 = vld [vmem:[%s4158_s21] ss:$0 sm:$0xff] }
 0x87e   : > { %v1774_v44 = vsel %vm1771_vm4, %v1773_v41, %v1769_v25  ;;  %v1920_v46 = vmul.f32 %v2798_v39, %v1918_v32  ;;  %1797 = vmatpush.msra.mxu1 %v1777_v43  ;;  %vm1925_vm7 = vweird.f32 %v2798_v39  ;;  %vm1847_vm13 = vmor %vm1845_vm12, %vm1846_vm9  ;;  %v2092_v38 = vld [vmem:[#allocation14 + $0x18] sm:$0xff]  ;;  %v2090_v41 = vld [vmem:[#allocation14 + $0x8] sm:$0xff] }
 0x87f   : > { %v1842_v47 = vsub.f32 1.0, %v1841_v42  ;;  %v1775_v48 = vmul.f32 %v3886_v1, %v1774_v44  ;;  %vm1926_vm10 = vmor %vm1924_vm8, %vm1925_vm7 }
 0x880   : > { %v1921_v49 = vsub.f32 1.0, %v1920_v46  ;;  %v1935_v50 = vpop.permute.xlu0 %1934 }
 0x881   : > { %v1843_v55 = vmul.f32 %v2796_v40, %v1842_v47  ;;  %2576 = vmatmul.msk.f32.vlgmr.msra.gmra.mxu1 %vm1137_vm1, %v1775_v48 }
 0x882   : > { %v1922_v56 = vmul.f32 %v2798_v39, %v1921_v49  ;;  %1955 = vmatpush.msrb.mxu1 %v1935_v50 }
 0x883   : > { %v1844_v59 = vadd.f32 %v2796_v40, %v1843_v55 }
 0x884   : > { %v1923_v58 = vadd.f32 %v2798_v39, %v1922_v56  ;;  %2112 = vmatpush.msra.mxu1 %v2092_v38 }
 0x885   : > { %v1848_v4 = vsel %vm1847_vm13, %v2796_v40, %v1844_v59  ;;  %v2091_v40 = vld [vmem:[#allocation14 + $0x10] sm:$0xff] }
 0x886   : > { %v1927_v62 = vsel %vm1926_vm10, %v2798_v39, %v1923_v58  ;;  %v1853_v5 = vsel %vm1850_vm14, %v1852_v2, %v1848_v4  ;;  %2113 = vmatpush.msra.mxu1 %v2091_v40  ;;  %v2089_v39 = vld [vmem:[#allocation14] sm:$0xff] }
 0x887   : > { %v1932_v0 = vsel %vm1929_vm11, %v1931_v60, %v1927_v62  ;;  %v1854_v7 = vmul.f32 %v3890_v8, %v1853_v5  ;;  %v2760_v60 = vld [vmem:[#allocation13] ss:$0 sm:$0xff] }
 0x888   : > { %v1933_v1 = vmul.f32 %v3892_v9, %v1932_v0  ;;  %2114 = vmatpush.msra.mxu1 %v2090_v41 }
 0x88a   : > { %2582 = vmatmul.msk.f32.vlgmr.msrb.gmra.mxu1 %vm1137_vm1, %v1933_v1 }
 0x88b   : > { %2115 = vmatpush.msra.mxu1 %v2089_v39 }
 0x88c   : > { %v1720_v9 = vpop.f32.mrf.mxu0 }
 0x88e   : > { %v1856_v6 = vpop.permute.xlu1 %1855 }
 0x88f   : > { %1876 = vmatpush.msra.mxu0 %v1856_v6 }
 0x890   : > { %2579 = vmatmul.msk.f32.vlgmr.msra.gmra.mxu0 %vm1137_vm1, %v1854_v7 }
 0x891   : > { %2037 = vmatpush.msrb.mxu0 %v3788_v45 }
 0x893   : > { %2038 = vmatpush.msrb.mxu0 %v3796_v52 }
 0x895   : > { %2039 = vmatpush.msrb.mxu0 %v3800_v53 }
 0x897   : > { %2040 = vmatpush.msrb.mxu0 %v3803_v54 }
 0x899   : > { %2175 = vmatpush.msra.mxu0 %v3788_v45  ;;  %v1990_v45 = vld [vmem:[#allocation11 + $0x10] sm:$0xff] }
 0x89b   : > { %2176 = vmatpush.msra.mxu0 %v3796_v52  ;;  %v1989_v52 = vld [vmem:[#allocation11 + $0x8] sm:$0xff] }
 0x89d   : > { %2177 = vmatpush.msra.mxu0 %v3800_v53  ;;  %v1988_v53 = vld [vmem:[#allocation11] sm:$0xff] }
 0x89f   : > { %2178 = vmatpush.msra.mxu0 %v3803_v54 }
 0x8fe   : > { %v1799_v8 = vpop.f32.mrf.mxu1 }
 0x8ff   : > { %1973 = vrot.lane.b32.xlu2 %v1799_v8, %s4155_s10 }
 0x907   : > { %v1957_v10 = vpop.f32.mrf.mxu1  ;;  %1451 = vrot.lane.b32.xlu2 %v3756_v20, %s4155_s10  ;;  %v1991_v20 = vld [vmem:[#allocation11 + $0x18] sm:$0xff] }
 0x908   : > { %1981 = vrot.lane.b32.xlu1 %v1957_v10, %s4156_s18  ;;  %2011 = vmatpush.msrb.mxu3 %v1991_v20 }
 0x90a   : > { %2012 = vmatpush.msrb.mxu3 %v1990_v45 }
 0x90c   : > { %2013 = vmatpush.msrb.mxu3 %v1989_v52 }
 0x90d   : > { %v1878_v11 = vpop.f32.mrf.mxu0 }
 0x90e   : > { %1977 = vrot.lane.b32.xlu0 %v1878_v11, %s3282_s17  ;;  %2014 = vmatpush.msrb.mxu3 %v1988_v53 }
 0x90f   : > { %1960 = vrot.lane.b32.xlu2 %v1775_v48, %s4155_s10  ;;  %s2249_s10 = sshll.u32 %s1074_s25, 4  ;;  %s2250_s10 = int_to_ptr.vmem [resolvable:$true] %s2249_s10 }
 0x910   : > { %1457 = vrot.lane.b32.xlu1 %v3764_v31, %s4156_s18 }
 0x916   : > { %1454 = vrot.lane.b32.xlu0 %v3769_v36, %s3282_s17 }
 0x918   : > { %1966 = vrot.lane.b32.xlu1 %v1933_v1, %s4156_s18  ;;  %s4159_s18 = sld [smem:[#allocation56_spill]]  ;;  %v2761_v1 = vld [vmem:[#allocation16] ss:$0 sm:$0xff] }
 0x91e   : > { %1963 = vrot.lane.b32.xlu0 %v1854_v7, %s3282_s17  ;;  %v2128_v25 = vld [vmem:[%s4159_s18 + $0x38] sm:$0xff]  ;;  %v2126_v42 = vld [vmem:[%s4159_s18 + $0x28] sm:$0xff]  ;;  %v2125_v43 = vld [vmem:[%s4159_s18 + $0x20] sm:$0xff]  ;;  %s3179_s17 = scalar_lea.hbm %s3178_s27, 8 }
 0x91f   : > { %2145 = vmatpush.msra.mxu3 %v2128_v25  ;;  %v2124_v47 = vld [vmem:[%s4159_s18 + $0x18] sm:$0xff]  ;;  %v2123_v63 = vld [vmem:[%s4159_s18 + $0x10] sm:$0xff]  ;;  %v2122_v0 = vld [vmem:[%s4159_s18 + $0x8] sm:$0xff]  ;;  %p3180_p11 = scmp.ne.s32.totalorder %s3178_s27, %s3179_s17  ;;  %p3185_p13 = scmp.lt.s32.totalorder %s3183_s29, %s3179_s17 }
 0x920   : > { %v2121_v4 = vld [vmem:[%s4159_s18] sm:$0xff] }
 0x921   : > { %v2762_v7 = vld [vmem:[#allocation17] ss:$0 sm:$0xff]  ;;  %p3181_p3 = pnand %p3180_p11, %p3515_p4  ;;  %p3186_p0 = por %p3185_p13, %p3184_p9 }
 0x923   : > { %p3182_p7 = pneg %p3181_p3 }
 0x925   : > { %p3187_p2 = pnand %p3186_p0, %p3182_p7 }
 0x959   : > { %v1974_v54 = vpop.permute.xlu2 %1973 }
 0x95a   : > { %v1984_v31 = vsel %vm1137_vm1, %v1720_v9, %v1974_v54 }
 0x961   : > { %v1452_v15 = vpop.permute.xlu2 %1451 }
 0x962   : > { %v1460_v17 = vsel %vm1137_vm1, %v3750_v3, %v1452_v15  ;;  %v2763_v15 = vld [vmem:[%s4161_s5] ss:$0 sm:$0xff] }
 0x969   : > { %v1961_v23 = vpop.permute.xlu2 %1960 }
 0x96a   : > { %v1969_v24 = vsel %vm1137_vm1, %v3898_v26, %v1961_v23 }
 0x97a   : > { %v1982_v12 = vpop.permute.xlu1 %1981 }
 0x980   : > { %v1978_v13 = vpop.permute.xlu0 %1977 }
 0x981   : > { %v1985_v36 = vsel %vm1461_vm5, %v1984_v31, %v1978_v13 }
 0x982   : > { %v1986_v14 = vsel %vm1463_vm6, %v1985_v36, %v1982_v12  ;;  %v1458_v16 = vpop.permute.xlu1 %1457 }
 0x983   : > { %2583 = vmatmul.msk.f32.vlgmr.msrb.gmra.mxu3 %vm1109_vm0, %v1986_v14 }
 0x988   : > { %v1455_v18 = vpop.permute.xlu0 %1454 }
 0x989   : > { %v1462_v19 = vsel %vm1461_vm5, %v1460_v17, %v1455_v18  ;;  %v2764_v18 = vld [vmem:[#allocation19] ss:$0 sm:$0xff] }
 0x98a   : > { %v1464_v21 = vsel %vm1463_vm6, %v1462_v19, %v1458_v16  ;;  %v1967_v27 = vpop.permute.xlu1 %1966 }
 0x98b   : > { %1480 = vst.msk [vmem:[%s1090_s2] sm:$0xff] %vm1109_vm0, %v1464_v21 }
 0x990   : > { %v1964_v3 = vpop.permute.xlu0 %1963 }
 0x991   : > { %v1970_v28 = vsel %vm1461_vm5, %v1969_v24, %v1964_v3 }
 0x992   : > { %v1971_v29 = vsel %vm1463_vm6, %v1970_v28, %v1967_v27 }
 0x993   : > { %1987 = vst.msk [vmem:[%s1094_s7] sm:$0xff] %vm1109_vm0, %v1971_v29 }
 0xa06   : > { %v2016_v32 = vpop.f32.mrf.mxu3 }
 0xa07   : > { %v2017_v33 = vadd.f32 %v2758_v30, %v2016_v32 }
 0xa09   : > { %v2019_v26 = vadd.f32 %v2017_v33, %v3835_v22  ;;  %v2127_v22 = vld [vmem:[%s4159_s18 + $0x30] sm:$0xff] }
 0xa0a   : > { %2146 = vmatpush.msra.mxu3 %v2127_v22 }
 0xa0b   : > { %2584 = vmatmul.msk.f32.vlgmr.msrb.gmra.mxu0 %vm1109_vm0, %v2019_v26 }
 0xa0c   : > { %2147 = vmatpush.msra.mxu3 %v2126_v42 }
 0xa0e   : > { %2148 = vmatpush.msra.mxu3 %v2125_v43 }
 0xa10   : > { %2149 = vmatpush.msra.mxu3 %v2124_v47 }
 0xa12   : > { %2150 = vmatpush.msra.mxu3 %v2123_v63 }
 0xa14   : > { %2151 = vmatpush.msra.mxu3 %v2122_v0 }
 0xa16   : > { %2152 = vmatpush.msra.mxu3 %v2121_v4 }
 0xa88   : > { %v2042_v34 = vpop.f32.mrf.mxu0 }
 0xa89   : > { %v2045_v35 = vsub.f32 %v2019_v26, %v2042_v34 }
 0xa8b   : > { %v2046_v37 = vmul.f32 %v2045_v35, %v2045_v35 }
 0xa8d   : > { %2585 = vmatmul.msk.f32.vlgmr.msra.gmra.mxu2 %vm1109_vm0, %v2046_v37 }
 0xb10   : > { %v2067_v44 = vpop.f32.mrf.mxu2 }
 0xb11   : > { %v2068_v46 = vadd.f32 1e-05, %v2067_v44 }
 0xb13   : > { %2799 = vrsqrt.f32 %v2068_v46  ;;  %vm2076_vm5 = vweird.f32 %v2068_v46 }
 0xb19   : > { %v2800_v48 = vpop.eup %2799 }
 0xb1a   : > { %v2071_v49 = vmul.f32 %v2800_v48, %v2068_v46  ;;  %vm2077_vm1 = vweird.f32 %v2800_v48 }
 0xb1b   : > { %vm2078_vm6 = vmor %vm2076_vm5, %vm2077_vm1 }
 0xb1c   : > { %v2072_v50 = vmul.f32 %v2800_v48, %v2071_v49 }
 0xb1e   : > { %v2073_v51 = vmul.f32 0.5, %v2072_v50 }
 0xb20   : > { %v2074_v55 = vsub.f32 1.5, %v2073_v51 }
 0xb22   : > { %v2075_v56 = vmul.f32 %v2800_v48, %v2074_v55 }
 0xb24   : > { %v2079_v58 = vsel %vm2078_vm6, %v2800_v48, %v2075_v56 }
 0xb25   : > { %v2080_v59 = vmul.f32 %v2079_v58, %v2045_v35 }
 0xb27   : > { %v2084_v61 = vmul.f32 %v2759_v57, %v2080_v59 }
 0xb29   : > { %v2088_v62 = vadd.f32 %v2760_v60, %v2084_v61 }
 0xb2b   : > { %2586 = vmatmul.msk.f32.vlgmr.msra.gmra.mxu1 %vm1109_vm0, %v2088_v62 }
 0xba8   : > { %v2117_v2 = vpop.f32.mrf.mxu1 }
 0xba9   : > { %v2118_v5 = vadd.f32 %v2761_v1, %v2117_v2 }
 0xbab   : > { %v2120_v6 = vmax.f32 %v2118_v5, 0.0 }
 0xbad   : > { %2587 = vmatmul.msk.f32.vlgmr.msra.gmra.mxu3 %vm2133_vm15, %v2120_v6 }
 0xc30   : > { %v2154_v8 = vpop.f32.mrf.mxu3 }
 0xc31   : > { %v2155_v9 = vadd.f32 %v2762_v7, %v2154_v8 }
 0xc33   : > { %v2157_v10 = vadd.f32 %v2155_v9, %v2088_v62 }
 0xc35   : > { %2588 = vmatmul.msk.f32.vlgmr.msra.gmra.mxu0 %vm1109_vm0, %v2157_v10 }
 0xcb2   : > { %v2180_v11 = vpop.f32.mrf.mxu0 }
 0xcb3   : > { %v2183_v20 = vsub.f32 %v2157_v10, %v2180_v11 }
 0xcb5   : > { %v2184_v45 = vmul.f32 %v2183_v20, %v2183_v20 }
 0xcb7   : > { %2589 = vmatmul.msk.f32.vlgmr.msrb.gmra.mxu2 %vm1109_vm0, %v2184_v45 }
 0xd3a   : > { %v2205_v52 = vpop.f32.mrf.mxu2 }
 0xd3b   : > { %v2206_v53 = vadd.f32 1e-05, %v2205_v52 }
 0xd3d   : > { %2801 = vrsqrt.f32 %v2206_v53  ;;  %vm2214_vm3 = vweird.f32 %v2206_v53 }
 0xd43   : > { %v2802_v54 = vpop.eup %2801 }
 0xd44   : > { %v2209_v12 = vmul.f32 %v2802_v54, %v2206_v53  ;;  %vm2215_vm2 = vweird.f32 %v2802_v54 }
 0xd45   : > { %vm2216_vm4 = vmor %vm2214_vm3, %vm2215_vm2 }
 0xd46   : > { %v2210_v31 = vmul.f32 %v2802_v54, %v2209_v12 }
 0xd48   : > { %v2211_v13 = vmul.f32 0.5, %v2210_v31 }
 0xd4a   : > { %v2212_v36 = vsub.f32 1.5, %v2211_v13 }
 0xd4c   : > { %v2213_v14 = vmul.f32 %v2802_v54, %v2212_v36 }
 0xd4e   : > { %v2217_v16 = vsel %vm2216_vm4, %v2802_v54, %v2213_v14 }
 0xd4f   : > { %v2218_v17 = vmul.f32 %v2217_v16, %v2183_v20 }
 0xd51   : > { %v2222_v19 = vmul.f32 %v2763_v15, %v2218_v17 }
 0xd53   : > { %v2226_v21 = vadd.f32 %v2764_v18, %v2222_v19 }
 0xd55   : > { %2227 = vst.msk [vmem:[%s1074_s25] sm:$0xff] %vm1109_vm0, %v2226_v21 }
 0xd56   : > { %3190 = shalt.err (!%p3187_p2)
}
 0xd57   : > { %2634 = dma.vmem_to_hbm [thread:$0]  (%p3515_p4), %s2250_s10, 128, %s2252_s28, %s2229_s0  }
 0xd58 PF: > { %s4164_s11 = sld [smem:[#allocation32_spill]]  ;;  %p4166_p12 = scmp.ge.s32.totalorder %s3257_s30, 2 }
 0xd5a   : > { %p2675_p1 = pnand %p4166_p12, %p3519_p5 }
 0xd5c   : > { %p2676_p8 = pneg %p2675_p1 }
 0xd5e   : > { %s2269_s7 = sand.u32 1, %s4164_s11  }
 0xd5f   : > { %s2270_s9 = scalar_lea.sflag [#allocation4], %s2269_s7 }
 0xd60   : > { %3240 = dma.done.wait (%p2676_p8), %s2270_s9, 128  }
 0xd61   : > { %3242 = vsyncadd (%p2676_p8), %s2270_s9, 4294967168  ;;  %s4167_s30 = sld [smem:[#allocation33_spill]]  ;;  %s4169_s7 = smov %s3249_s4 }
 0xd62   : > { %s4168_s25 = sld [smem:[#allocation34_spill]]  ;;  %s4170_s4 = smov %s3253_s8 }
 0xd67   : > { %p51_p10 = scmp.ge.s32.totalorder %s4167_s30, 4  }
 0xd68   : > { %s4171_s8 = smov %s4168_s25 }
 0xd69   :  { %53 = sbr.rel (!%p51_p10) target bundleno = 38 (0x26), region = 258 }
 0xd6e   :  { %2290 = vsyncpa [#allocation3], 1 }
 0xd6f   :  { %2292 = vsyncpa [#allocation3 + $0x1], 1 }
 0xd70   :  { %2293 = vsyncpa [#allocation6], 1 }
 0xd71   :  { %2295 = vsyncpa [#allocation6 + $0x1], 1 }
 0xd72   :  { %2296 = vsyncpa [#allocation9], 1 }
 0xd73   :  { %2298 = vsyncpa [#allocation9 + $0x1], 1 }
 0xd74   :  { %2299 = vsyncpa [#allocation12], 1 }
 0xd75   :  { %2300 = vsyncpa [#allocation15], 1 }
 0xd76   :  { %2301 = vsyncpa [#allocation18], 1 }
 0xd77   :  { %2302 = vsyncpa [#allocation21], 1 }
 0xd78   :  { %2303 = vsyncpa [#allocation4], 1 }
 0xd79   :  { %2305 = vsyncpa [#allocation4 + $0x1], 1 }

</bundles_post_ra>
